<compile_context>
chip_gen: v7x
topology: tpu7x:2x2x1
jax: 0.10.0
libtpu: 0.0.40
codegen_flags: <defaults>
</compile_context>

<pallas_src>
import functools

import jax
import jax.numpy as jnp
from jax.experimental import pallas as pl
from jax.experimental.pallas import tpu as pltpu


VMEM_LIMIT = 48 * 1024 * 1024  # v7x has 64 MiB physical per TC; stay under.


# ---------------------------------------------------------------------------
# helpers
# ---------------------------------------------------------------------------

def _tile(dim, target, align):
    """Largest divisor of `dim` that is <= target and a multiple of `align`,
    else the full dim (full extent always satisfies the (8,128) layout rule)."""
    if dim <= target:
        return dim
    t = (target // align) * align
    while t >= align:
        if dim % t == 0:
            return t
        t -= align
    return dim


def _heads_per_group(num_heads, dH):
    """Smallest head-group size whose output width is a multiple of 128 lanes
    (lane-dense stores); fall back to all heads (full-H store)."""
    for g in range(1, num_heads + 1):
        if num_heads % g == 0 and (g * dH) % 128 == 0:
            return g
    return num_heads


# ---------------------------------------------------------------------------
# Pallas kernels
# ---------------------------------------------------------------------------

def _linear_kernel(x_ref, w_ref, b_ref, o_ref, acc_ref, *, activation):
    k = pl.program_id(2)

    @pl.when(k == 0)
    def _():
        acc_ref[...] = jnp.zeros_like(acc_ref)

    xv = x_ref[...]
    if xv.dtype != jnp.bfloat16:          # skip cast when input is already bf16
        xv = xv.astype(jnp.bfloat16)
    acc_ref[...] += jnp.dot(xv, w_ref[...], preferred_element_type=jnp.float32)

    @pl.when(k == pl.num_programs(2) - 1)
    def _():
        y = acc_ref[...] + b_ref[...]
        if activation == "gelu":
            # tanh-approx GELU (HF BERT uses erf GELU; ~1e-3 deviation)
            c = jnp.float32(0.7978845608028654)  # sqrt(2/pi)
            y = 0.5 * y * (1.0 + jnp.tanh(c * (y + 0.044715 * y * y * y)))
        o_ref[...] = y.astype(o_ref.dtype)


def _linear_add_ln_kernel(x_ref, w_ref, b_ref, r_ref, g_ref, be_ref,
                          o_ref, acc_ref):
    # matmul + bias + residual add + layernorm, LN fused into the finalize.
    k = pl.program_id(1)

    @pl.when(k == 0)
    def _():
        acc_ref[...] = jnp.zeros_like(acc_ref)

    xv = x_ref[...]
    if xv.dtype != jnp.bfloat16:
        xv = xv.astype(jnp.bfloat16)
    acc_ref[...] += jnp.dot(xv, w_ref[...], preferred_element_type=jnp.float32)

    @pl.when(k == pl.num_programs(1) - 1)
    def _():
        y = acc_ref[...] + b_ref[...] + r_ref[...]
        mu = jnp.mean(y, axis=-1, keepdims=True)
        var = jnp.mean(jnp.square(y - mu), axis=-1, keepdims=True)
        o_ref[...] = ((y - mu) * jax.lax.rsqrt(var + 1e-12)
                      * g_ref[...] + be_ref[...]).astype(o_ref.dtype)


def _layernorm_kernel(x_ref, g_ref, b_ref, o_ref):
    x = x_ref[...]
    mu = jnp.mean(x, axis=-1, keepdims=True)
    var = jnp.mean(jnp.square(x - mu), axis=-1, keepdims=True)
    o_ref[...] = (x - mu) * jax.lax.rsqrt(var + 1e-12) * g_ref[...] + b_ref[...]


def _attention_kernel(qkv_ref, m_ref, o_ref, *, heads_per_step, dH):
    # qkv_ref: (S, g*3*dH) bf16, per-head interleaved [q_h | k_h | v_h] blocks,
    #          1/sqrt(dH) already folded into the q columns at init.
    # m_ref:   (1, S)      f32 additive key mask.
    # o_ref:   (S, g*dH)   bf16, this head-group's outputs, one dense store.
    m = m_ref[...]
    outs = []
    for h in range(heads_per_step):
        base = 3 * dH * h
        q = qkv_ref[:, base:base + dH]                 # Ref slices, not whole slab
        k = qkv_ref[:, base + dH:base + 2 * dH]
        v = qkv_ref[:, base + 2 * dH:base + 3 * dH]
        s = jax.lax.dot_general(q, k, (((1,), (1,)), ((), ())),
                                preferred_element_type=jnp.float32)   # (S, S)
        s = s + m
        s = s - jnp.max(s, axis=-1, keepdims=True)
        p = jnp.exp(s)                                  # f32 exp (v5e-safe)
        p = p * pl.reciprocal(jnp.sum(p, axis=-1, keepdims=True), approx=True)
        outs.append(jnp.dot(p.astype(jnp.bfloat16), v,
                            preferred_element_type=jnp.float32))
    o_ref[...] = jnp.concatenate(outs, axis=-1).astype(o_ref.dtype)


def _pool_kernel(h_ref, m_ref, o_ref):
    # Sbert forward: sum(hidden * mask) / clamp(sum(mask), 1e-9)
    h = h_ref[...]                                        # (S, H)
    m = m_ref[...]                                        # (1, S)
    summed = jnp.dot(m, h, preferred_element_type=jnp.float32)        # (1, H)
    denom = jnp.maximum(jnp.sum(m, axis=-1, keepdims=True), 1e-9)     # (1, 1)
    o_ref[...] = summed / denom


# ---------------------------------------------------------------------------
# Pallas wrappers
# ---------------------------------------------------------------------------

def linear(x, w, b, activation=None, out_dtype=jnp.float32,
           *, tm_t=512, tn_t=512, tk_t=1024):
    """x: (M, K), w: (K, N) bf16, b: (N,) f32 -> (M, N) out_dtype."""
    M, K = x.shape
    N = w.shape[1]
    tm = _tile(M, tm_t, 8)
    tn = _tile(N, tn_t, 128)
    tk = _tile(K, tk_t, 128)        # full K (<=1024): single K step, no revisits
    kernel = functools.partial(_linear_kernel, activation=activation)
    return pl.pallas_call(
        kernel,
        out_shape=jax.ShapeDtypeStruct((M, N), out_dtype),
        grid=(M // tm, N // tn, K // tk),
        in_specs=[pl.BlockSpec((tm, tk), lambda i, j, k: (i, k)),
                  pl.BlockSpec((tk, tn), lambda i, j, k: (k, j)),
                  pl.BlockSpec((1, tn), lambda i, j, k: (0, j))],
        out_specs=pl.BlockSpec((tm, tn), lambda i, j, k: (i, j)),
        scratch_shapes=[pltpu.VMEM((tm, tn), jnp.float32)],
        compiler_params=pltpu.CompilerParams(
            dimension_semantics=("parallel", "parallel", "arbitrary"),
            vmem_limit_bytes=VMEM_LIMIT),
    )(x, w, b.reshape(1, N))


def linear_add_ln(x, w, b, residual, gamma, beta, *, tm_t=512, tk_t=1024):
    """(x @ w + b + residual) -> layernorm, fused.  tn = full N so the LN row
    is complete in the finalize.  x: (M, K), w: (K, N) bf16, rest f32."""
    M, K = x.shape
    N = w.shape[1]
    tm = _tile(M, tm_t, 8)
    tk = _tile(K, tk_t, 128)
    return pl.pallas_call(
        _linear_add_ln_kernel,
        out_shape=jax.ShapeDtypeStruct((M, N), jnp.float32),
        grid=(M // tm, K // tk),
        in_specs=[pl.BlockSpec((tm, tk), lambda i, k: (i, k)),
                  pl.BlockSpec((tk, N), lambda i, k: (k, 0)),
                  pl.BlockSpec((1, N), lambda i, k: (0, 0)),
                  pl.BlockSpec((tm, N), lambda i, k: (i, 0)),
                  pl.BlockSpec((1, N), lambda i, k: (0, 0)),
                  pl.BlockSpec((1, N), lambda i, k: (0, 0))],
        out_specs=pl.BlockSpec((tm, N), lambda i, k: (i, 0)),
        scratch_shapes=[pltpu.VMEM((tm, N), jnp.float32)],
        compiler_params=pltpu.CompilerParams(
            dimension_semantics=("parallel", "arbitrary"),
            vmem_limit_bytes=VMEM_LIMIT),
    )(x, w, b.reshape(1, N), residual, gamma.reshape(1, N), beta.reshape(1, N))


def layernorm(x, gamma, beta, *, tm_t=512):
    M, H = x.shape
    tm = _tile(M, tm_t, 8)
    return pl.pallas_call(
        _layernorm_kernel,
        out_shape=jax.ShapeDtypeStruct((M, H), jnp.float32),
        grid=(M // tm,),
        in_specs=[pl.BlockSpec((tm, H), lambda i: (i, 0)),
                  pl.BlockSpec((1, H), lambda i: (0, 0)),
                  pl.BlockSpec((1, H), lambda i: (0, 0))],
        out_specs=pl.BlockSpec((tm, H), lambda i: (i, 0)),
        compiler_params=pltpu.CompilerParams(
            dimension_semantics=("parallel",)),
    )(x, gamma.reshape(1, H), beta.reshape(1, H))


def attention(qkv, mask_add, num_heads):
    """qkv: (B, S, 3H) bf16, per-head interleaved [q_h|k_h|v_h] columns with
    the softmax scale pre-folded into q; mask_add: (B, 1, S) additive mask."""
    B, S, H3 = qkv.shape
    H = H3 // 3
    dH = H // num_heads
    g = _heads_per_group(num_heads, dH)
    ng = num_heads // g
    kern = functools.partial(_attention_kernel, heads_per_step=g, dH=dH)
    return pl.pallas_call(
        kern,
        out_shape=jax.ShapeDtypeStruct((B, S, H), jnp.bfloat16),
        grid=(B, ng),
        in_specs=[pl.BlockSpec((None, S, 3 * dH * g), lambda b, hg: (b, 0, hg)),
                  pl.BlockSpec((None, 1, S), lambda b, hg: (b, 0, 0))],
        out_specs=pl.BlockSpec((None, S, dH * g), lambda b, hg: (b, 0, hg)),
        compiler_params=pltpu.CompilerParams(
            dimension_semantics=("parallel", "parallel"),
            vmem_limit_bytes=VMEM_LIMIT),
    )(qkv, mask_add)


def masked_mean_pool(hidden, maskf):
    """hidden: (B, S, H) f32; maskf: (B, 1, S) f32 -> (B, H) f32."""
    B, S, H = hidden.shape
    out = pl.pallas_call(
        _pool_kernel,
        out_shape=jax.ShapeDtypeStruct((B, 1, H), jnp.float32),
        grid=(B,),
        in_specs=[pl.BlockSpec((None, S, H), lambda b: (b, 0, 0)),
                  pl.BlockSpec((None, 1, S), lambda b: (b, 0, 0))],
        out_specs=pl.BlockSpec((None, 1, H), lambda b: (b, 0, 0)),
        compiler_params=pltpu.CompilerParams(
            dimension_semantics=("parallel",)),
    )(hidden, maskf)
    return out.reshape(B, H)


# ---------------------------------------------------------------------------
# Deterministic parameter init (synthetic "BertModel" weights)
# ---------------------------------------------------------------------------

def init_params(key, vocab, max_pos, H, FF, nlayers, num_heads):
    std = 0.02
    dH = H // num_heads
    scale = 1.0 / float(dH) ** 0.5
    keys = jax.random.split(key, 3 + nlayers)
    params = {
        "word_emb": jax.random.normal(keys[0], (vocab, H), jnp.float32) * std,
        "pos_emb": jax.random.normal(keys[1], (max_pos, H), jnp.float32) * std,
        "type_emb": jax.random.normal(keys[2], (2, H), jnp.float32) * std,
        "emb_ln_g": jnp.ones((H,), jnp.float32),
        "emb_ln_b": jnp.zeros((H,), jnp.float32),
        "layers": [],
    }
    for l in range(nlayers):
        lk = jax.random.split(keys[3 + l], 6)
        wq = jax.random.normal(lk[0], (H, H), jnp.float32) * std
        wk = jax.random.normal(lk[1], (H, H), jnp.float32) * std
        wv = jax.random.normal(lk[2], (H, H), jnp.float32) * std
        # Fused QKV, per-head interleaved [q_h | k_h | v_h] columns, with the
        # 1/sqrt(dH) attention scale folded into the q columns (param
        # transform, removes a per-head VPU multiply in the kernel).
        cols = []
        for h in range(num_heads):
            sl = slice(h * dH, (h + 1) * dH)
            cols += [wq[:, sl] * scale, wk[:, sl], wv[:, sl]]
        params["layers"].append({
            "w_qkv": jnp.concatenate(cols, axis=1).astype(jnp.bfloat16),
            "b_qkv": jnp.zeros((3 * H,), jnp.float32),   # interleaved layout
            "wo": (jax.random.normal(lk[3], (H, H), jnp.float32)
                   * std).astype(jnp.bfloat16),
            "bo": jnp.zeros((H,), jnp.float32),
            "ln1_g": jnp.ones((H,), jnp.float32),
            "ln1_b": jnp.zeros((H,), jnp.float32),
            "w1": (jax.random.normal(lk[4], (H, FF), jnp.float32)
                   * std).astype(jnp.bfloat16),
            "b1": jnp.zeros((FF,), jnp.float32),
            "w2": (jax.random.normal(lk[5], (FF, H), jnp.float32)
                   * std).astype(jnp.bfloat16),
            "b2": jnp.zeros((H,), jnp.float32),
            "ln2_g": jnp.ones((H,), jnp.float32),
            "ln2_b": jnp.zeros((H,), jnp.float32),
        })
    return params


# ---------------------------------------------------------------------------
# Sbert.forward(in1, in1m)
# ---------------------------------------------------------------------------

def sbert_forward(params, in1, in1m, *, num_heads):
    B, S = in1.shape
    H = params["word_emb"].shape[1]

    # TODO(synk): embedding row-gather stays in XLA (no rectangular BlockSpec
    # form worth a Pallas kernel at this size); layernorm is Pallas.
    x = (params["word_emb"][in1]
         + params["pos_emb"][jnp.arange(S)][None, :, :]
         + params["type_emb"][0][None, None, :])
    x2 = layernorm(x.reshape(B * S, H), params["emb_ln_g"], params["emb_ln_b"])

    # Masks: f32 key mask (B,1,S) for pooling; HF-style additive mask for attn.
    maskf = in1m.astype(jnp.float32).reshape(B, 1, S)
    mask_add = (1.0 - maskf) * -10000.0                   # (B, 1, S)

    for lp in params["layers"]:
        # fused QKV projection -> bf16 intermediate (consumer is a matmul)
        qkv = linear(x2, lp["w_qkv"], lp["b_qkv"], out_dtype=jnp.bfloat16)
        ctx = attention(qkv.reshape(B, S, 3 * H), mask_add, num_heads)
        # wo matmul + bias + residual + layernorm fused (f32 LN output)
        x2 = linear_add_ln(ctx.reshape(B * S, H), lp["wo"], lp["bo"],
                           x2, lp["ln1_g"], lp["ln1_b"])
        # w1 + GELU -> bf16 intermediate (consumer is the w2 matmul)
        ff = linear(x2, lp["w1"], lp["b1"], activation="gelu",
                    out_dtype=jnp.bfloat16)
        # w2 matmul + bias + residual + layernorm fused
        x2 = linear_add_ln(ff, lp["w2"], lp["b2"],
                           x2, lp["ln2_g"], lp["ln2_b"])

    seq_out = x2.reshape(B, S, H)            # == loss1 (last hidden state)
    # Sbert masked mean pooling (the module's own forward math), in Pallas.
    return masked_mean_pool(seq_out, maskf)


# ---------------------------------------------------------------------------

if __name__ == "__main__":
    B, S, H, NH, FF, L, VOCAB = 2, 8, 32, 4, 64, 2, 64

    key = jax.random.PRNGKey(0)
    pkey, ikey = jax.random.split(key)
    params = init_params(pkey, VOCAB, S, H, FF, L, NH)

    in1 = jax.random.randint(ikey, (B, S), 0, VOCAB, dtype=jnp.int32)
    in1m = jnp.array([[1, 1, 1, 1, 1, 0, 0, 0],
                      [1, 1, 1, 1, 1, 1, 1, 0]], dtype=jnp.int32)

    fwd = jax.jit(functools.partial(sbert_forward, num_heads=NH))
    out = fwd(params, in1, in1m)
    out = jax.block_until_ready(out)
    assert out.shape == (B, H) and out.dtype == jnp.float32
    assert bool(jnp.all(jnp.isfinite(out)))
    print("KERNEL_OK")
</pallas_src>

<mosaic_0001>
module attributes {stable_mosaic.version = 11 : i64} {
  func.func @_linear_kernel(%arg0: i32, %arg1: i32, %arg2: i32, %arg3: memref<16x32xf32, #tpu.memory_space<vmem>>, %arg4: memref<32x96xbf16, #tpu.memory_space<vmem>>, %arg5: memref<1x96xf32, #tpu.memory_space<vmem>>, %arg6: memref<16x96xbf16, #tpu.memory_space<vmem>>, %arg7: memref<16x96xf32, #tpu.memory_space<vmem>>) attributes {dimension_semantics = [#tpu.dimension_semantics<parallel>, #tpu.dimension_semantics<parallel>, #tpu.dimension_semantics<arbitrary>], iteration_bounds = array<i64: 1, 1, 1>, scalar_prefetch = 0 : i64, scratch_operands = 1 : i64, tpu.core_type = #tpu.core_type<tc>, window_params = [{transform_indices = @transform_0, window_bounds = array<i64: 16, 32>}, {transform_indices = @transform_1, window_bounds = array<i64: 32, 96>}, {transform_indices = @transform_2, window_bounds = array<i64: 1, 96>}, {transform_indices = @transform_3, window_bounds = array<i64: 16, 96>}]} {
    %c0_i32 = arith.constant 0 : i32
    %0 = arith.cmpi eq, %arg2, %c0_i32 : i32
    %1 = arith.extui %0 : i1 to i32
    %c0_i32_0 = arith.constant 0 : i32
    %2 = arith.cmpi ne, %1, %c0_i32_0 : i32
    scf.if %2 {
      %cst_10 = arith.constant 0.000000e+00 : f32
      %13 = vector.broadcast %cst_10 : f32 to vector<16x96xf32>
      %c0_11 = arith.constant 0 : index
      %c0_12 = arith.constant 0 : index
      %14 = vector.load %arg7[%c0_11, %c0_12] : memref<16x96xf32, #tpu.memory_space<vmem>>, vector<16x96xf32>
      tpu.vector_store %arg7[%c0_11, %c0_12], %13 {strides = array<i32>} : memref<16x96xf32, #tpu.memory_space<vmem>>, vector<16x96xf32>,
    } else {
    }
    %c0 = arith.constant 0 : index
    %c0_1 = arith.constant 0 : index
    %3 = vector.load %arg3[%c0, %c0_1] : memref<16x32xf32, #tpu.memory_space<vmem>>, vector<16x32xf32>
    %4 = arith.truncf %3 : vector<16x32xf32> to vector<16x32xbf16>
    %c0_2 = arith.constant 0 : index
    %c0_3 = arith.constant 0 : index
    %5 = vector.load %arg7[%c0_2, %c0_3] : memref<16x96xf32, #tpu.memory_space<vmem>>, vector<16x96xf32>
    %c0_4 = arith.constant 0 : index
    %c0_5 = arith.constant 0 : index
    %6 = vector.load %arg4[%c0_4, %c0_5] : memref<32x96xbf16, #tpu.memory_space<vmem>>, vector<32x96xbf16>
    %cst = arith.constant dense<0.000000e+00> : vector<16x96xf32>
    %7 = tpu.matmul %4, %6, %cst {dimension_numbers = #tpu.dot_dimension_numbers<[1], [0], [0], [1], [0, 0, 1, 1], [], []>} : vector<16x32xbf16>, vector<32x96xbf16>, vector<16x96xf32> -> vector<16x96xf32>
    %8 = arith.addf %5, %7 : vector<16x96xf32>
    %c0_6 = arith.constant 0 : index
    %c0_7 = arith.constant 0 : index
    %9 = vector.load %arg7[%c0_6, %c0_7] : memref<16x96xf32, #tpu.memory_space<vmem>>, vector<16x96xf32>
    tpu.vector_store %arg7[%c0_6, %c0_7], %8 {strides = array<i32>} : memref<16x96xf32, #tpu.memory_space<vmem>>, vector<16x96xf32>,
    %c0_i32_8 = arith.constant 0 : i32
    %10 = arith.cmpi eq, %arg2, %c0_i32_8 : i32
    %11 = arith.extui %10 : i1 to i32
    %c0_i32_9 = arith.constant 0 : i32
    %12 = arith.cmpi ne, %11, %c0_i32_9 : i32
    scf.if %12 {
      %c0_10 = arith.constant 0 : index
      %c0_11 = arith.constant 0 : index
      %13 = vector.load %arg7[%c0_10, %c0_11] : memref<16x96xf32, #tpu.memory_space<vmem>>, vector<16x96xf32>
      %c0_12 = arith.constant 0 : index
      %c0_13 = arith.constant 0 : index
      %14 = vector.load %arg5[%c0_12, %c0_13] : memref<1x96xf32, #tpu.memory_space<vmem>>, vector<1x96xf32>
      %15 = vector.broadcast %14 : vector<1x96xf32> to vector<16x96xf32>
      %16 = arith.addf %13, %15 : vector<16x96xf32>
      %17 = arith.truncf %16 : vector<16x96xf32> to vector<16x96xbf16>
      %c0_14 = arith.constant 0 : index
      %c0_15 = arith.constant 0 : index
      %18 = vector.load %arg6[%c0_14, %c0_15] : memref<16x96xbf16, #tpu.memory_space<vmem>>, vector<16x96xbf16>
      tpu.vector_store %arg6[%c0_14, %c0_15], %17 {strides = array<i32>} : memref<16x96xbf16, #tpu.memory_space<vmem>>, vector<16x96xbf16>,
    } else {
    }
    return
  }
  func.func @transform_0(%arg0: i32, %arg1: i32, %arg2: i32) -> (i32, i32) {
    %c0_i32 = arith.constant 0 : i32
    return %arg0, %arg2 : i32, i32
  }
  func.func @transform_1(%arg0: i32, %arg1: i32, %arg2: i32) -> (i32, i32) {
    %c0_i32 = arith.constant 0 : i32
    return %arg2, %arg1 : i32, i32
  }
  func.func @transform_2(%arg0: i32, %arg1: i32, %arg2: i32) -> (i32, i32) {
    %c0_i32 = arith.constant 0 : i32
    %c0_i32_0 = arith.constant 0 : i32
    return %c0_i32, %arg1 : i32, i32
  }
  func.func @transform_3(%arg0: i32, %arg1: i32, %arg2: i32) -> (i32, i32) {
    %c0_i32 = arith.constant 0 : i32
    return %arg0, %arg1 : i32, i32
  }
}

module attributes {stable_mosaic.version = 11 : i64} {
  func.func @_layernorm_kernel(%arg0: i32, %arg1: memref<16x32xf32, #tpu.memory_space<vmem>>, %arg2: memref<1x32xf32, #tpu.memory_space<vmem>>, %arg3: memref<1x32xf32, #tpu.memory_space<vmem>>, %arg4: memref<16x32xf32, #tpu.memory_space<vmem>>) attributes {dimension_semantics = [#tpu.dimension_semantics<parallel>], iteration_bounds = array<i64: 1>, scalar_prefetch = 0 : i64, scratch_operands = 0 : i64, tpu.core_type = #tpu.core_type<tc>, window_params = [{transform_indices = @transform_0, window_bounds = array<i64: 16, 32>}, {pipeline_mode = #tpu.pipeline_mode<synchronous>, transform_indices = @transform_1, window_bounds = array<i64: 1, 32>}, {pipeline_mode = #tpu.pipeline_mode<synchronous>, transform_indices = @transform_2, window_bounds = array<i64: 1, 32>}, {transform_indices = @transform_3, window_bounds = array<i64: 16, 32>}]} {
    %c0 = arith.constant 0 : index
    %c0_0 = arith.constant 0 : index
    %0 = vector.load %arg1[%c0, %c0_0] : memref<16x32xf32, #tpu.memory_space<vmem>>, vector<16x32xf32>
    %cst = arith.constant dense<0.000000e+00> : vector<16xf32>
    %1 = vector.multi_reduction <add>, %0, %cst [1] : vector<16x32xf32> to vector<16xf32>
    %2 = vector.shape_cast %1 : vector<16xf32> to vector<16x1xf32>
    %cst_1 = arith.constant 3.200000e+01 : f32
    %3 = vector.broadcast %cst_1 : f32 to vector<16x1xf32>
    %4 = arith.divf %2, %3 : vector<16x1xf32>
    %5 = vector.broadcast %4 : vector<16x1xf32> to vector<16x32xf32>
    %6 = arith.subf %0, %5 : vector<16x32xf32>
    %7 = arith.mulf %6, %6 : vector<16x32xf32>
    %cst_2 = arith.constant dense<0.000000e+00> : vector<16xf32>
    %8 = vector.multi_reduction <add>, %7, %cst_2 [1] : vector<16x32xf32> to vector<16xf32>
    %9 = vector.shape_cast %8 : vector<16xf32> to vector<16x1xf32>
    %cst_3 = arith.constant 3.200000e+01 : f32
    %10 = vector.broadcast %cst_3 : f32 to vector<16x1xf32>
    %11 = arith.divf %9, %10 : vector<16x1xf32>
    %12 = vector.broadcast %4 : vector<16x1xf32> to vector<16x32xf32>
    %13 = arith.subf %0, %12 : vector<16x32xf32>
    %cst_4 = arith.constant 9.99999996E-13 : f32
    %14 = vector.broadcast %cst_4 : f32 to vector<16x1xf32>
    %15 = arith.addf %11, %14 : vector<16x1xf32>
    %16 = math.rsqrt %15 : vector<16x1xf32>
    %17 = vector.broadcast %16 : vector<16x1xf32> to vector<16x32xf32>
    %18 = arith.mulf %13, %17 : vector<16x32xf32>
    %c0_5 = arith.constant 0 : index
    %c0_6 = arith.constant 0 : index
    %19 = vector.load %arg2[%c0_5, %c0_6] : memref<1x32xf32, #tpu.memory_space<vmem>>, vector<1x32xf32>
    %20 = vector.broadcast %19 : vector<1x32xf32> to vector<16x32xf32>
    %21 = arith.mulf %18, %20 : vector<16x32xf32>
    %c0_7 = arith.constant 0 : index
    %c0_8 = arith.constant 0 : index
    %22 = vector.load %arg3[%c0_7, %c0_8] : memref<1x32xf32, #tpu.memory_space<vmem>>, vector<1x32xf32>
    %23 = vector.broadcast %22 : vector<1x32xf32> to vector<16x32xf32>
    %24 = arith.addf %21, %23 : vector<16x32xf32>
    %c0_9 = arith.constant 0 : index
    %c0_10 = arith.constant 0 : index
    %25 = vector.load %arg4[%c0_9, %c0_10] : memref<16x32xf32, #tpu.memory_space<vmem>>, vector<16x32xf32>
    tpu.vector_store %arg4[%c0_9, %c0_10], %24 {strides = array<i32>} : memref<16x32xf32, #tpu.memory_space<vmem>>, vector<16x32xf32>,
    return
  }
  func.func @transform_0(%arg0: i32) -> (i32, i32) {
    %c0_i32 = arith.constant 0 : i32
    %c0_i32_0 = arith.constant 0 : i32
    return %arg0, %c0_i32 : i32, i32
  }
  func.func @transform_1(%arg0: i32) -> (i32, i32) {
    %c0_i32 = arith.constant 0 : i32
    %c0_i32_0 = arith.constant 0 : i32
    %c0_i32_1 = arith.constant 0 : i32
    return %c0_i32, %c0_i32_0 : i32, i32
  }
  func.func @transform_2(%arg0: i32) -> (i32, i32) {
    %c0_i32 = arith.constant 0 : i32
    %c0_i32_0 = arith.constant 0 : i32
    %c0_i32_1 = arith.constant 0 : i32
    return %c0_i32, %c0_i32_0 : i32, i32
  }
  func.func @transform_3(%arg0: i32) -> (i32, i32) {
    %c0_i32 = arith.constant 0 : i32
    %c0_i32_0 = arith.constant 0 : i32
    return %arg0, %c0_i32 : i32, i32
  }
}

module attributes {stable_mosaic.version = 11 : i64} {
  func.func @_linear_add_ln_kernel(%arg0: i32, %arg1: i32, %arg2: memref<16x32xbf16, #tpu.memory_space<vmem>>, %arg3: memref<32x32xbf16, #tpu.memory_space<vmem>>, %arg4: memref<1x32xf32, #tpu.memory_space<vmem>>, %arg5: memref<16x32xf32, #tpu.memory_space<vmem>>, %arg6: memref<1x32xf32, #tpu.memory_space<vmem>>, %arg7: memref<1x32xf32, #tpu.memory_space<vmem>>, %arg8: memref<16x32xf32, #tpu.memory_space<vmem>>, %arg9: memref<16x32xf32, #tpu.memory_space<vmem>>) attributes {dimension_semantics = [#tpu.dimension_semantics<parallel>, #tpu.dimension_semantics<arbitrary>], iteration_bounds = array<i64: 1, 1>, scalar_prefetch = 0 : i64, scratch_operands = 1 : i64, tpu.core_type = #tpu.core_type<tc>, window_params = [{transform_indices = @transform_0, window_bounds = array<i64: 16, 32>}, {transform_indices = @transform_1, window_bounds = array<i64: 32, 32>}, {pipeline_mode = #tpu.pipeline_mode<synchronous>, transform_indices = @transform_2, window_bounds = array<i64: 1, 32>}, {transform_indices = @transform_3, window_bounds = array<i64: 16, 32>}, {pipeline_mode = #tpu.pipeline_mode<synchronous>, transform_indices = @transform_4, window_bounds = array<i64: 1, 32>}, {pipeline_mode = #tpu.pipeline_mode<synchronous>, transform_indices = @transform_5, window_bounds = array<i64: 1, 32>}, {transform_indices = @transform_6, window_bounds = array<i64: 16, 32>}]} {
    %c0_i32 = arith.constant 0 : i32
    %0 = arith.cmpi eq, %arg1, %c0_i32 : i32
    %1 = arith.extui %0 : i1 to i32
    %c0_i32_0 = arith.constant 0 : i32
    %2 = arith.cmpi ne, %1, %c0_i32_0 : i32
    scf.if %2 {
      %cst_10 = arith.constant 0.000000e+00 : f32
      %12 = vector.broadcast %cst_10 : f32 to vector<16x32xf32>
      %c0_11 = arith.constant 0 : index
      %c0_12 = arith.constant 0 : index
      %13 = vector.load %arg9[%c0_11, %c0_12] : memref<16x32xf32, #tpu.memory_space<vmem>>, vector<16x32xf32>
      tpu.vector_store %arg9[%c0_11, %c0_12], %12 {strides = array<i32>} : memref<16x32xf32, #tpu.memory_space<vmem>>, vector<16x32xf32>,
    } else {
    }
    %c0 = arith.constant 0 : index
    %c0_1 = arith.constant 0 : index
    %3 = vector.load %arg2[%c0, %c0_1] : memref<16x32xbf16, #tpu.memory_space<vmem>>, vector<16x32xbf16>
    %c0_2 = arith.constant 0 : index
    %c0_3 = arith.constant 0 : index
    %4 = vector.load %arg9[%c0_2, %c0_3] : memref<16x32xf32, #tpu.memory_space<vmem>>, vector<16x32xf32>
    %c0_4 = arith.constant 0 : index
    %c0_5 = arith.constant 0 : index
    %5 = vector.load %arg3[%c0_4, %c0_5] : memref<32x32xbf16, #tpu.memory_space<vmem>>, vector<32x32xbf16>
    %cst = arith.constant dense<0.000000e+00> : vector<16x32xf32>
    %6 = tpu.matmul %3, %5, %cst {dimension_numbers = #tpu.dot_dimension_numbers<[1], [0], [0], [1], [0, 0, 1, 1], [], []>} : vector<16x32xbf16>, vector<32x32xbf16>, vector<16x32xf32> -> vector<16x32xf32>
    %7 = arith.addf %4, %6 : vector<16x32xf32>
    %c0_6 = arith.constant 0 : index
    %c0_7 = arith.constant 0 : index
    %8 = vector.load %arg9[%c0_6, %c0_7] : memref<16x32xf32, #tpu.memory_space<vmem>>, vector<16x32xf32>
    tpu.vector_store %arg9[%c0_6, %c0_7], %7 {strides = array<i32>} : memref<16x32xf32, #tpu.memory_space<vmem>>, vector<16x32xf32>,
    %c0_i32_8 = arith.constant 0 : i32
    %9 = arith.cmpi eq, %arg1, %c0_i32_8 : i32
    %10 = arith.extui %9 : i1 to i32
    %c0_i32_9 = arith.constant 0 : i32
    %11 = arith.cmpi ne, %10, %c0_i32_9 : i32
    scf.if %11 {
      %c0_10 = arith.constant 0 : index
      %c0_11 = arith.constant 0 : index
      %12 = vector.load %arg9[%c0_10, %c0_11] : memref<16x32xf32, #tpu.memory_space<vmem>>, vector<16x32xf32>
      %c0_12 = arith.constant 0 : index
      %c0_13 = arith.constant 0 : index
      %13 = vector.load %arg4[%c0_12, %c0_13] : memref<1x32xf32, #tpu.memory_space<vmem>>, vector<1x32xf32>
      %14 = vector.broadcast %13 : vector<1x32xf32> to vector<16x32xf32>
      %15 = arith.addf %12, %14 : vector<16x32xf32>
      %c0_14 = arith.constant 0 : index
      %c0_15 = arith.constant 0 : index
      %16 = vector.load %arg5[%c0_14, %c0_15] : memref<16x32xf32, #tpu.memory_space<vmem>>, vector<16x32xf32>
      %17 = arith.addf %15, %16 : vector<16x32xf32>
      %cst_16 = arith.constant dense<0.000000e+00> : vector<16xf32>
      %18 = vector.multi_reduction <add>, %17, %cst_16 [1] : vector<16x32xf32> to vector<16xf32>
      %19 = vector.shape_cast %18 : vector<16xf32> to vector<16x1xf32>
      %cst_17 = arith.constant 3.200000e+01 : f32
      %20 = vector.broadcast %cst_17 : f32 to vector<16x1xf32>
      %21 = arith.divf %19, %20 : vector<16x1xf32>
      %22 = vector.broadcast %21 : vector<16x1xf32> to vector<16x32xf32>
      %23 = arith.subf %17, %22 : vector<16x32xf32>
      %24 = arith.mulf %23, %23 : vector<16x32xf32>
      %cst_18 = arith.constant dense<0.000000e+00> : vector<16xf32>
      %25 = vector.multi_reduction <add>, %24, %cst_18 [1] : vector<16x32xf32> to vector<16xf32>
      %26 = vector.shape_cast %25 : vector<16xf32> to vector<16x1xf32>
      %cst_19 = arith.constant 3.200000e+01 : f32
      %27 = vector.broadcast %cst_19 : f32 to vector<16x1xf32>
      %28 = arith.divf %26, %27 : vector<16x1xf32>
      %29 = vector.broadcast %21 : vector<16x1xf32> to vector<16x32xf32>
      %30 = arith.subf %17, %29 : vector<16x32xf32>
      %cst_20 = arith.constant 9.99999996E-13 : f32
      %31 = vector.broadcast %cst_20 : f32 to vector<16x1xf32>
      %32 = arith.addf %28, %31 : vector<16x1xf32>
      %33 = math.rsqrt %32 : vector<16x1xf32>
      %34 = vector.broadcast %33 : vector<16x1xf32> to vector<16x32xf32>
      %35 = arith.mulf %30, %34 : vector<16x32xf32>
      %c0_21 = arith.constant 0 : index
      %c0_22 = arith.constant 0 : index
      %36 = vector.load %arg6[%c0_21, %c0_22] : memref<1x32xf32, #tpu.memory_space<vmem>>, vector<1x32xf32>
      %37 = vector.broadcast %36 : vector<1x32xf32> to vector<16x32xf32>
      %38 = arith.mulf %35, %37 : vector<16x32xf32>
      %c0_23 = arith.constant 0 : index
      %c0_24 = arith.constant 0 : index
      %39 = vector.load %arg7[%c0_23, %c0_24] : memref<1x32xf32, #tpu.memory_space<vmem>>, vector<1x32xf32>
      %40 = vector.broadcast %39 : vector<1x32xf32> to vector<16x32xf32>
      %41 = arith.addf %38, %40 : vector<16x32xf32>
      %c0_25 = arith.constant 0 : index
      %c0_26 = arith.constant 0 : index
      %42 = vector.load %arg8[%c0_25, %c0_26] : memref<16x32xf32, #tpu.memory_space<vmem>>, vector<16x32xf32>
      tpu.vector_store %arg8[%c0_25, %c0_26], %41 {strides = array<i32>} : memref<16x32xf32, #tpu.memory_space<vmem>>, vector<16x32xf32>,
    } else {
    }
    return
  }
  func.func @transform_0(%arg0: i32, %arg1: i32) -> (i32, i32) {
    %c0_i32 = arith.constant 0 : i32
    return %arg0, %arg1 : i32, i32
  }
  func.func @transform_1(%arg0: i32, %arg1: i32) -> (i32, i32) {
    %c0_i32 = arith.constant 0 : i32
    %c0_i32_0 = arith.constant 0 : i32
    return %arg1, %c0_i32 : i32, i32
  }
  func.func @transform_2(%arg0: i32, %arg1: i32) -> (i32, i32) {
    %c0_i32 = arith.constant 0 : i32
    %c0_i32_0 = arith.constant 0 : i32
    %c0_i32_1 = arith.constant 0 : i32
    return %c0_i32, %c0_i32_0 : i32, i32
  }
  func.func @transform_3(%arg0: i32, %arg1: i32) -> (i32, i32) {
    %c0_i32 = arith.constant 0 : i32
    %c0_i32_0 = arith.constant 0 : i32
    return %arg0, %c0_i32 : i32, i32
  }
  func.func @transform_4(%arg0: i32, %arg1: i32) -> (i32, i32) {
    %c0_i32 = arith.constant 0 : i32
    %c0_i32_0 = arith.constant 0 : i32
    %c0_i32_1 = arith.constant 0 : i32
    return %c0_i32, %c0_i32_0 : i32, i32
  }
  func.func @transform_5(%arg0: i32, %arg1: i32) -> (i32, i32) {
    %c0_i32 = arith.constant 0 : i32
    %c0_i32_0 = arith.constant 0 : i32
    %c0_i32_1 = arith.constant 0 : i32
    return %c0_i32, %c0_i32_0 : i32, i32
  }
  func.func @transform_6(%arg0: i32, %arg1: i32) -> (i32, i32) {
    %c0_i32 = arith.constant 0 : i32
    %c0_i32_0 = arith.constant 0 : i32
    return %arg0, %c0_i32 : i32, i32
  }
}

module attributes {stable_mosaic.version = 11 : i64} {
  func.func @_attention_kernel(%arg0: i32, %arg1: i32, %arg2: memref<1x8x96xbf16, #tpu.memory_space<vmem>>, %arg3: memref<1x1x8xf32, #tpu.memory_space<vmem>>, %arg4: memref<1x8x32xbf16, #tpu.memory_space<vmem>>) attributes {dimension_semantics = [#tpu.dimension_semantics<parallel>, #tpu.dimension_semantics<parallel>], iteration_bounds = array<i64: 2, 1>, scalar_prefetch = 0 : i64, scratch_operands = 0 : i64, tpu.core_type = #tpu.core_type<tc>, window_params = [{transform_indices = @transform_0, window_bounds = array<i64: 1, 8, 96>}, {transform_indices = @transform_1, window_bounds = array<i64: 1, 1, 8>}, {transform_indices = @transform_2, window_bounds = array<i64: 1, 8, 32>}]} {
    %c0 = arith.constant 0 : index
    %c0_0 = arith.constant 0 : index
    %c0_1 = arith.constant 0 : index
    %0 = vector.load %arg3[%c0, %c0_0, %c0_1] : memref<1x1x8xf32, #tpu.memory_space<vmem>>, vector<1x1x8xf32>
    %1 = vector.shape_cast %0 : vector<1x1x8xf32> to vector<1x8xf32>
    %c0_2 = arith.constant 0 : index
    %c0_3 = arith.constant 0 : index
    %c0_4 = arith.constant 0 : index
    %2 = vector.load %arg2[%c0_2, %c0_3, %c0_4] : memref<1x8x96xbf16, #tpu.memory_space<vmem>>, vector<1x8x8xbf16>
    %3 = vector.shape_cast %2 : vector<1x8x8xbf16> to vector<8x8xbf16>
    %c0_5 = arith.constant 0 : index
    %c0_6 = arith.constant 0 : index
    %c8 = arith.constant 8 : index
    %4 = vector.load %arg2[%c0_5, %c0_6, %c8] : memref<1x8x96xbf16, #tpu.memory_space<vmem>>, vector<1x8x8xbf16>
    %5 = vector.shape_cast %4 : vector<1x8x8xbf16> to vector<8x8xbf16>
    %c0_7 = arith.constant 0 : index
    %c0_8 = arith.constant 0 : index
    %c16 = arith.constant 16 : index
    %6 = vector.load %arg2[%c0_7, %c0_8, %c16] : memref<1x8x96xbf16, #tpu.memory_space<vmem>>, vector<1x8x8xbf16>
    %7 = vector.shape_cast %6 : vector<1x8x8xbf16> to vector<8x8xbf16>
    %cst = arith.constant dense<0.000000e+00> : vector<8x8xf32>
    %8 = tpu.matmul %3, %5, %cst {dimension_numbers = #tpu.dot_dimension_numbers<[1], [1], [0], [0], [0, 0, 1, 0], [], []>} : vector<8x8xbf16>, vector<8x8xbf16>, vector<8x8xf32> -> vector<8x8xf32>
    %9 = vector.broadcast %1 : vector<1x8xf32> to vector<8x8xf32>
    %10 = arith.addf %8, %9 : vector<8x8xf32>
    %cst_9 = arith.constant dense<0xFF800000> : vector<8xf32>
    %11 = vector.multi_reduction <maximumf>, %10, %cst_9 [1] : vector<8x8xf32> to vector<8xf32>
    %12 = vector.shape_cast %11 : vector<8xf32> to vector<8x1xf32>
    %13 = vector.broadcast %12 : vector<8x1xf32> to vector<8x8xf32>
    %14 = arith.subf %10, %13 : vector<8x8xf32>
    %15 = math.exp %14 : vector<8x8xf32>
    %cst_10 = arith.constant dense<0.000000e+00> : vector<8xf32>
    %16 = vector.multi_reduction <add>, %15, %cst_10 [1] : vector<8x8xf32> to vector<8xf32>
    %17 = vector.shape_cast %16 : vector<8xf32> to vector<8x1xf32>
    %18 = tpu.reciprocal %17 {approx = true} : vector<8x1xf32> -> vector<8x1xf32>
    %19 = vector.broadcast %18 : vector<8x1xf32> to vector<8x8xf32>
    %20 = arith.mulf %15, %19 : vector<8x8xf32>
    %21 = arith.truncf %20 : vector<8x8xf32> to vector<8x8xbf16>
    %cst_11 = arith.constant dense<0.000000e+00> : vector<8x8xf32>
    %22 = tpu.matmul %21, %7, %cst_11 {dimension_numbers = #tpu.dot_dimension_numbers<[1], [0], [0], [1], [0, 0, 1, 1], [], []>} : vector<8x8xbf16>, vector<8x8xbf16>, vector<8x8xf32> -> vector<8x8xf32>
    %c0_12 = arith.constant 0 : index
    %c0_13 = arith.constant 0 : index
    %c24 = arith.constant 24 : index
    %23 = vector.load %arg2[%c0_12, %c0_13, %c24] : memref<1x8x96xbf16, #tpu.memory_space<vmem>>, vector<1x8x8xbf16>
    %24 = vector.shape_cast %23 : vector<1x8x8xbf16> to vector<8x8xbf16>
    %c0_14 = arith.constant 0 : index
    %c0_15 = arith.constant 0 : index
    %c32 = arith.constant 32 : index
    %25 = vector.load %arg2[%c0_14, %c0_15, %c32] : memref<1x8x96xbf16, #tpu.memory_space<vmem>>, vector<1x8x8xbf16>
    %26 = vector.shape_cast %25 : vector<1x8x8xbf16> to vector<8x8xbf16>
    %c0_16 = arith.constant 0 : index
    %c0_17 = arith.constant 0 : index
    %c40 = arith.constant 40 : index
    %27 = vector.load %arg2[%c0_16, %c0_17, %c40] : memref<1x8x96xbf16, #tpu.memory_space<vmem>>, vector<1x8x8xbf16>
    %28 = vector.shape_cast %27 : vector<1x8x8xbf16> to vector<8x8xbf16>
    %cst_18 = arith.constant dense<0.000000e+00> : vector<8x8xf32>
    %29 = tpu.matmul %24, %26, %cst_18 {dimension_numbers = #tpu.dot_dimension_numbers<[1], [1], [0], [0], [0, 0, 1, 0], [], []>} : vector<8x8xbf16>, vector<8x8xbf16>, vector<8x8xf32> -> vector<8x8xf32>
    %30 = vector.broadcast %1 : vector<1x8xf32> to vector<8x8xf32>
    %31 = arith.addf %29, %30 : vector<8x8xf32>
    %cst_19 = arith.constant dense<0xFF800000> : vector<8xf32>
    %32 = vector.multi_reduction <maximumf>, %31, %cst_19 [1] : vector<8x8xf32> to vector<8xf32>
    %33 = vector.shape_cast %32 : vector<8xf32> to vector<8x1xf32>
    %34 = vector.broadcast %33 : vector<8x1xf32> to vector<8x8xf32>
    %35 = arith.subf %31, %34 : vector<8x8xf32>
    %36 = math.exp %35 : vector<8x8xf32>
    %cst_20 = arith.constant dense<0.000000e+00> : vector<8xf32>
    %37 = vector.multi_reduction <add>, %36, %cst_20 [1] : vector<8x8xf32> to vector<8xf32>
    %38 = vector.shape_cast %37 : vector<8xf32> to vector<8x1xf32>
    %39 = tpu.reciprocal %38 {approx = true} : vector<8x1xf32> -> vector<8x1xf32>
    %40 = vector.broadcast %39 : vector<8x1xf32> to vector<8x8xf32>
    %41 = arith.mulf %36, %40 : vector<8x8xf32>
    %42 = arith.truncf %41 : vector<8x8xf32> to vector<8x8xbf16>
    %cst_21 = arith.constant dense<0.000000e+00> : vector<8x8xf32>
    %43 = tpu.matmul %42, %28, %cst_21 {dimension_numbers = #tpu.dot_dimension_numbers<[1], [0], [0], [1], [0, 0, 1, 1], [], []>} : vector<8x8xbf16>, vector<8x8xbf16>, vector<8x8xf32> -> vector<8x8xf32>
    %c0_22 = arith.constant 0 : index
    %c0_23 = arith.constant 0 : index
    %c48 = arith.constant 48 : index
    %44 = vector.load %arg2[%c0_22, %c0_23, %c48] : memref<1x8x96xbf16, #tpu.memory_space<vmem>>, vector<1x8x8xbf16>
    %45 = vector.shape_cast %44 : vector<1x8x8xbf16> to vector<8x8xbf16>
    %c0_24 = arith.constant 0 : index
    %c0_25 = arith.constant 0 : index
    %c56 = arith.constant 56 : index
    %46 = vector.load %arg2[%c0_24, %c0_25, %c56] : memref<1x8x96xbf16, #tpu.memory_space<vmem>>, vector<1x8x8xbf16>
    %47 = vector.shape_cast %46 : vector<1x8x8xbf16> to vector<8x8xbf16>
    %c0_26 = arith.constant 0 : index
    %c0_27 = arith.constant 0 : index
    %c64 = arith.constant 64 : index
    %48 = vector.load %arg2[%c0_26, %c0_27, %c64] : memref<1x8x96xbf16, #tpu.memory_space<vmem>>, vector<1x8x8xbf16>
    %49 = vector.shape_cast %48 : vector<1x8x8xbf16> to vector<8x8xbf16>
    %cst_28 = arith.constant dense<0.000000e+00> : vector<8x8xf32>
    %50 = tpu.matmul %45, %47, %cst_28 {dimension_numbers = #tpu.dot_dimension_numbers<[1], [1], [0], [0], [0, 0, 1, 0], [], []>} : vector<8x8xbf16>, vector<8x8xbf16>, vector<8x8xf32> -> vector<8x8xf32>
    %51 = vector.broadcast %1 : vector<1x8xf32> to vector<8x8xf32>
    %52 = arith.addf %50, %51 : vector<8x8xf32>
    %cst_29 = arith.constant dense<0xFF800000> : vector<8xf32>
    %53 = vector.multi_reduction <maximumf>, %52, %cst_29 [1] : vector<8x8xf32> to vector<8xf32>
    %54 = vector.shape_cast %53 : vector<8xf32> to vector<8x1xf32>
    %55 = vector.broadcast %54 : vector<8x1xf32> to vector<8x8xf32>
    %56 = arith.subf %52, %55 : vector<8x8xf32>
    %57 = math.exp %56 : vector<8x8xf32>
    %cst_30 = arith.constant dense<0.000000e+00> : vector<8xf32>
    %58 = vector.multi_reduction <add>, %57, %cst_30 [1] : vector<8x8xf32> to vector<8xf32>
    %59 = vector.shape_cast %58 : vector<8xf32> to vector<8x1xf32>
    %60 = tpu.reciprocal %59 {approx = true} : vector<8x1xf32> -> vector<8x1xf32>
    %61 = vector.broadcast %60 : vector<8x1xf32> to vector<8x8xf32>
    %62 = arith.mulf %57, %61 : vector<8x8xf32>
    %63 = arith.truncf %62 : vector<8x8xf32> to vector<8x8xbf16>
    %cst_31 = arith.constant dense<0.000000e+00> : vector<8x8xf32>
    %64 = tpu.matmul %63, %49, %cst_31 {dimension_numbers = #tpu.dot_dimension_numbers<[1], [0], [0], [1], [0, 0, 1, 1], [], []>} : vector<8x8xbf16>, vector<8x8xbf16>, vector<8x8xf32> -> vector<8x8xf32>
    %c0_32 = arith.constant 0 : index
    %c0_33 = arith.constant 0 : index
    %c72 = arith.constant 72 : index
    %65 = vector.load %arg2[%c0_32, %c0_33, %c72] : memref<1x8x96xbf16, #tpu.memory_space<vmem>>, vector<1x8x8xbf16>
    %66 = vector.shape_cast %65 : vector<1x8x8xbf16> to vector<8x8xbf16>
    %c0_34 = arith.constant 0 : index
    %c0_35 = arith.constant 0 : index
    %c80 = arith.constant 80 : index
    %67 = vector.load %arg2[%c0_34, %c0_35, %c80] : memref<1x8x96xbf16, #tpu.memory_space<vmem>>, vector<1x8x8xbf16>
    %68 = vector.shape_cast %67 : vector<1x8x8xbf16> to vector<8x8xbf16>
    %c0_36 = arith.constant 0 : index
    %c0_37 = arith.constant 0 : index
    %c88 = arith.constant 88 : index
    %69 = vector.load %arg2[%c0_36, %c0_37, %c88] : memref<1x8x96xbf16, #tpu.memory_space<vmem>>, vector<1x8x8xbf16>
    %70 = vector.shape_cast %69 : vector<1x8x8xbf16> to vector<8x8xbf16>
    %cst_38 = arith.constant dense<0.000000e+00> : vector<8x8xf32>
    %71 = tpu.matmul %66, %68, %cst_38 {dimension_numbers = #tpu.dot_dimension_numbers<[1], [1], [0], [0], [0, 0, 1, 0], [], []>} : vector<8x8xbf16>, vector<8x8xbf16>, vector<8x8xf32> -> vector<8x8xf32>
    %72 = vector.broadcast %1 : vector<1x8xf32> to vector<8x8xf32>
    %73 = arith.addf %71, %72 : vector<8x8xf32>
    %cst_39 = arith.constant dense<0xFF800000> : vector<8xf32>
    %74 = vector.multi_reduction <maximumf>, %73, %cst_39 [1] : vector<8x8xf32> to vector<8xf32>
    %75 = vector.shape_cast %74 : vector<8xf32> to vector<8x1xf32>
    %76 = vector.broadcast %75 : vector<8x1xf32> to vector<8x8xf32>
    %77 = arith.subf %73, %76 : vector<8x8xf32>
    %78 = math.exp %77 : vector<8x8xf32>
    %cst_40 = arith.constant dense<0.000000e+00> : vector<8xf32>
    %79 = vector.multi_reduction <add>, %78, %cst_40 [1] : vector<8x8xf32> to vector<8xf32>
    %80 = vector.shape_cast %79 : vector<8xf32> to vector<8x1xf32>
    %81 = tpu.reciprocal %80 {approx = true} : vector<8x1xf32> -> vector<8x1xf32>
    %82 = vector.broadcast %81 : vector<8x1xf32> to vector<8x8xf32>
    %83 = arith.mulf %78, %82 : vector<8x8xf32>
    %84 = arith.truncf %83 : vector<8x8xf32> to vector<8x8xbf16>
    %cst_41 = arith.constant dense<0.000000e+00> : vector<8x8xf32>
    %85 = tpu.matmul %84, %70, %cst_41 {dimension_numbers = #tpu.dot_dimension_numbers<[1], [0], [0], [1], [0, 0, 1, 1], [], []>} : vector<8x8xbf16>, vector<8x8xbf16>, vector<8x8xf32> -> vector<8x8xf32>
    %86 = tpu.concatenate %22, %43, %64, %85 in 1 : vector<8x8xf32>, vector<8x8xf32>, vector<8x8xf32>, vector<8x8xf32> -> vector<8x32xf32>
    %87 = arith.truncf %86 : vector<8x32xf32> to vector<8x32xbf16>
    %c0_42 = arith.constant 0 : index
    %c0_43 = arith.constant 0 : index
    %c0_44 = arith.constant 0 : index
    %88 = vector.load %arg4[%c0_42, %c0_43, %c0_44] : memref<1x8x32xbf16, #tpu.memory_space<vmem>>, vector<1x8x32xbf16>
    %89 = vector.shape_cast %88 : vector<1x8x32xbf16> to vector<8x32xbf16>
    %90 = vector.shape_cast %87 : vector<8x32xbf16> to vector<1x8x32xbf16>
    tpu.vector_store %arg4[%c0_42, %c0_43, %c0_44], %90 {strides = array<i32>} : memref<1x8x32xbf16, #tpu.memory_space<vmem>>, vector<1x8x32xbf16>,
    return
  }
  func.func @transform_0(%arg0: i32, %arg1: i32) -> (i32, i32, i32) {
    %c0_i32 = arith.constant 0 : i32
    %c0_i32_0 = arith.constant 0 : i32
    return %arg0, %c0_i32, %arg1 : i32, i32, i32
  }
  func.func @transform_1(%arg0: i32, %arg1: i32) -> (i32, i32, i32) {
    %c0_i32 = arith.constant 0 : i32
    %c0_i32_0 = arith.constant 0 : i32
    %c0_i32_1 = arith.constant 0 : i32
    return %arg0, %c0_i32, %c0_i32_0 : i32, i32, i32
  }
  func.func @transform_2(%arg0: i32, %arg1: i32) -> (i32, i32, i32) {
    %c0_i32 = arith.constant 0 : i32
    %c0_i32_0 = arith.constant 0 : i32
    return %arg0, %c0_i32, %arg1 : i32, i32, i32
  }
}

module attributes {stable_mosaic.version = 11 : i64} {
  func.func @_linear_kernel(%arg0: i32, %arg1: i32, %arg2: i32, %arg3: memref<16x32xf32, #tpu.memory_space<vmem>>, %arg4: memref<32x64xbf16, #tpu.memory_space<vmem>>, %arg5: memref<1x64xf32, #tpu.memory_space<vmem>>, %arg6: memref<16x64xbf16, #tpu.memory_space<vmem>>, %arg7: memref<16x64xf32, #tpu.memory_space<vmem>>) attributes {dimension_semantics = [#tpu.dimension_semantics<parallel>, #tpu.dimension_semantics<parallel>, #tpu.dimension_semantics<arbitrary>], iteration_bounds = array<i64: 1, 1, 1>, scalar_prefetch = 0 : i64, scratch_operands = 1 : i64, tpu.core_type = #tpu.core_type<tc>, window_params = [{transform_indices = @transform_0, window_bounds = array<i64: 16, 32>}, {transform_indices = @transform_1, window_bounds = array<i64: 32, 64>}, {transform_indices = @transform_2, window_bounds = array<i64: 1, 64>}, {transform_indices = @transform_3, window_bounds = array<i64: 16, 64>}]} {
    %c0_i32 = arith.constant 0 : i32
    %0 = arith.cmpi eq, %arg2, %c0_i32 : i32
    %1 = arith.extui %0 : i1 to i32
    %c0_i32_0 = arith.constant 0 : i32
    %2 = arith.cmpi ne, %1, %c0_i32_0 : i32
    scf.if %2 {
      %cst_10 = arith.constant 0.000000e+00 : f32
      %13 = vector.broadcast %cst_10 : f32 to vector<16x64xf32>
      %c0_11 = arith.constant 0 : index
      %c0_12 = arith.constant 0 : index
      %14 = vector.load %arg7[%c0_11, %c0_12] : memref<16x64xf32, #tpu.memory_space<vmem>>, vector<16x64xf32>
      tpu.vector_store %arg7[%c0_11, %c0_12], %13 {strides = array<i32>} : memref<16x64xf32, #tpu.memory_space<vmem>>, vector<16x64xf32>,
    } else {
    }
    %c0 = arith.constant 0 : index
    %c0_1 = arith.constant 0 : index
    %3 = vector.load %arg3[%c0, %c0_1] : memref<16x32xf32, #tpu.memory_space<vmem>>, vector<16x32xf32>
    %4 = arith.truncf %3 : vector<16x32xf32> to vector<16x32xbf16>
    %c0_2 = arith.constant 0 : index
    %c0_3 = arith.constant 0 : index
    %5 = vector.load %arg7[%c0_2, %c0_3] : memref<16x64xf32, #tpu.memory_space<vmem>>, vector<16x64xf32>
    %c0_4 = arith.constant 0 : index
    %c0_5 = arith.constant 0 : index
    %6 = vector.load %arg4[%c0_4, %c0_5] : memref<32x64xbf16, #tpu.memory_space<vmem>>, vector<32x64xbf16>
    %cst = arith.constant dense<0.000000e+00> : vector<16x64xf32>
    %7 = tpu.matmul %4, %6, %cst {dimension_numbers = #tpu.dot_dimension_numbers<[1], [0], [0], [1], [0, 0, 1, 1], [], []>} : vector<16x32xbf16>, vector<32x64xbf16>, vector<16x64xf32> -> vector<16x64xf32>
    %8 = arith.addf %5, %7 : vector<16x64xf32>
    %c0_6 = arith.constant 0 : index
    %c0_7 = arith.constant 0 : index
    %9 = vector.load %arg7[%c0_6, %c0_7] : memref<16x64xf32, #tpu.memory_space<vmem>>, vector<16x64xf32>
    tpu.vector_store %arg7[%c0_6, %c0_7], %8 {strides = array<i32>} : memref<16x64xf32, #tpu.memory_space<vmem>>, vector<16x64xf32>,
    %c0_i32_8 = arith.constant 0 : i32
    %10 = arith.cmpi eq, %arg2, %c0_i32_8 : i32
    %11 = arith.extui %10 : i1 to i32
    %c0_i32_9 = arith.constant 0 : i32
    %12 = arith.cmpi ne, %11, %c0_i32_9 : i32
    scf.if %12 {
      %c0_10 = arith.constant 0 : index
      %c0_11 = arith.constant 0 : index
      %13 = vector.load %arg7[%c0_10, %c0_11] : memref<16x64xf32, #tpu.memory_space<vmem>>, vector<16x64xf32>
      %c0_12 = arith.constant 0 : index
      %c0_13 = arith.constant 0 : index
      %14 = vector.load %arg5[%c0_12, %c0_13] : memref<1x64xf32, #tpu.memory_space<vmem>>, vector<1x64xf32>
      %15 = vector.broadcast %14 : vector<1x64xf32> to vector<16x64xf32>
      %16 = arith.addf %13, %15 : vector<16x64xf32>
      %cst_14 = arith.constant 5.000000e-01 : f32
      %17 = vector.broadcast %cst_14 : f32 to vector<16x64xf32>
      %18 = arith.mulf %17, %16 : vector<16x64xf32>
      %cst_15 = arith.constant 4.471500e-02 : f32
      %19 = vector.broadcast %cst_15 : f32 to vector<16x64xf32>
      %20 = arith.mulf %19, %16 : vector<16x64xf32>
      %21 = arith.mulf %20, %16 : vector<16x64xf32>
      %22 = arith.mulf %21, %16 : vector<16x64xf32>
      %23 = arith.addf %16, %22 : vector<16x64xf32>
      %cst_16 = arith.constant 0.797884583 : f32
      %24 = vector.broadcast %cst_16 : f32 to vector<16x64xf32>
      %25 = arith.mulf %24, %23 : vector<16x64xf32>
      %26 = math.tanh %25 : vector<16x64xf32>
      %cst_17 = arith.constant 1.000000e+00 : f32
      %27 = vector.broadcast %cst_17 : f32 to vector<16x64xf32>
      %28 = arith.addf %27, %26 : vector<16x64xf32>
      %29 = arith.mulf %18, %28 : vector<16x64xf32>
      %30 = arith.truncf %29 : vector<16x64xf32> to vector<16x64xbf16>
      %c0_18 = arith.constant 0 : index
      %c0_19 = arith.constant 0 : index
      %31 = vector.load %arg6[%c0_18, %c0_19] : memref<16x64xbf16, #tpu.memory_space<vmem>>, vector<16x64xbf16>
      tpu.vector_store %arg6[%c0_18, %c0_19], %30 {strides = array<i32>} : memref<16x64xbf16, #tpu.memory_space<vmem>>, vector<16x64xbf16>,
    } else {
    }
    return
  }
  func.func @transform_0(%arg0: i32, %arg1: i32, %arg2: i32) -> (i32, i32) {
    %c0_i32 = arith.constant 0 : i32
    return %arg0, %arg2 : i32, i32
  }
  func.func @transform_1(%arg0: i32, %arg1: i32, %arg2: i32) -> (i32, i32) {
    %c0_i32 = arith.constant 0 : i32
    return %arg2, %arg1 : i32, i32
  }
  func.func @transform_2(%arg0: i32, %arg1: i32, %arg2: i32) -> (i32, i32) {
    %c0_i32 = arith.constant 0 : i32
    %c0_i32_0 = arith.constant 0 : i32
    return %c0_i32, %arg1 : i32, i32
  }
  func.func @transform_3(%arg0: i32, %arg1: i32, %arg2: i32) -> (i32, i32) {
    %c0_i32 = arith.constant 0 : i32
    return %arg0, %arg1 : i32, i32
  }
}

module attributes {stable_mosaic.version = 11 : i64} {
  func.func @_linear_add_ln_kernel(%arg0: i32, %arg1: i32, %arg2: memref<16x64xbf16, #tpu.memory_space<vmem>>, %arg3: memref<64x32xbf16, #tpu.memory_space<vmem>>, %arg4: memref<1x32xf32, #tpu.memory_space<vmem>>, %arg5: memref<16x32xf32, #tpu.memory_space<vmem>>, %arg6: memref<1x32xf32, #tpu.memory_space<vmem>>, %arg7: memref<1x32xf32, #tpu.memory_space<vmem>>, %arg8: memref<16x32xf32, #tpu.memory_space<vmem>>, %arg9: memref<16x32xf32, #tpu.memory_space<vmem>>) attributes {dimension_semantics = [#tpu.dimension_semantics<parallel>, #tpu.dimension_semantics<arbitrary>], iteration_bounds = array<i64: 1, 1>, scalar_prefetch = 0 : i64, scratch_operands = 1 : i64, tpu.core_type = #tpu.core_type<tc>, window_params = [{transform_indices = @transform_0, window_bounds = array<i64: 16, 64>}, {transform_indices = @transform_1, window_bounds = array<i64: 64, 32>}, {pipeline_mode = #tpu.pipeline_mode<synchronous>, transform_indices = @transform_2, window_bounds = array<i64: 1, 32>}, {transform_indices = @transform_3, window_bounds = array<i64: 16, 32>}, {pipeline_mode = #tpu.pipeline_mode<synchronous>, transform_indices = @transform_4, window_bounds = array<i64: 1, 32>}, {pipeline_mode = #tpu.pipeline_mode<synchronous>, transform_indices = @transform_5, window_bounds = array<i64: 1, 32>}, {transform_indices = @transform_6, window_bounds = array<i64: 16, 32>}]} {
    %c0_i32 = arith.constant 0 : i32
    %0 = arith.cmpi eq, %arg1, %c0_i32 : i32
    %1 = arith.extui %0 : i1 to i32
    %c0_i32_0 = arith.constant 0 : i32
    %2 = arith.cmpi ne, %1, %c0_i32_0 : i32
    scf.if %2 {
      %cst_10 = arith.constant 0.000000e+00 : f32
      %12 = vector.broadcast %cst_10 : f32 to vector<16x32xf32>
      %c0_11 = arith.constant 0 : index
      %c0_12 = arith.constant 0 : index
      %13 = vector.load %arg9[%c0_11, %c0_12] : memref<16x32xf32, #tpu.memory_space<vmem>>, vector<16x32xf32>
      tpu.vector_store %arg9[%c0_11, %c0_12], %12 {strides = array<i32>} : memref<16x32xf32, #tpu.memory_space<vmem>>, vector<16x32xf32>,
    } else {
    }
    %c0 = arith.constant 0 : index
    %c0_1 = arith.constant 0 : index
    %3 = vector.load %arg2[%c0, %c0_1] : memref<16x64xbf16, #tpu.memory_space<vmem>>, vector<16x64xbf16>
    %c0_2 = arith.constant 0 : index
    %c0_3 = arith.constant 0 : index
    %4 = vector.load %arg9[%c0_2, %c0_3] : memref<16x32xf32, #tpu.memory_space<vmem>>, vector<16x32xf32>
    %c0_4 = arith.constant 0 : index
    %c0_5 = arith.constant 0 : index
    %5 = vector.load %arg3[%c0_4, %c0_5] : memref<64x32xbf16, #tpu.memory_space<vmem>>, vector<64x32xbf16>
    %cst = arith.constant dense<0.000000e+00> : vector<16x32xf32>
    %6 = tpu.matmul %3, %5, %cst {dimension_numbers = #tpu.dot_dimension_numbers<[1], [0], [0], [1], [0, 0, 1, 1], [], []>} : vector<16x64xbf16>, vector<64x32xbf16>, vector<16x32xf32> -> vector<16x32xf32>
    %7 = arith.addf %4, %6 : vector<16x32xf32>
    %c0_6 = arith.constant 0 : index
    %c0_7 = arith.constant 0 : index
    %8 = vector.load %arg9[%c0_6, %c0_7] : memref<16x32xf32, #tpu.memory_space<vmem>>, vector<16x32xf32>
    tpu.vector_store %arg9[%c0_6, %c0_7], %7 {strides = array<i32>} : memref<16x32xf32, #tpu.memory_space<vmem>>, vector<16x32xf32>,
    %c0_i32_8 = arith.constant 0 : i32
    %9 = arith.cmpi eq, %arg1, %c0_i32_8 : i32
    %10 = arith.extui %9 : i1 to i32
    %c0_i32_9 = arith.constant 0 : i32
    %11 = arith.cmpi ne, %10, %c0_i32_9 : i32
    scf.if %11 {
      %c0_10 = arith.constant 0 : index
      %c0_11 = arith.constant 0 : index
      %12 = vector.load %arg9[%c0_10, %c0_11] : memref<16x32xf32, #tpu.memory_space<vmem>>, vector<16x32xf32>
      %c0_12 = arith.constant 0 : index
      %c0_13 = arith.constant 0 : index
      %13 = vector.load %arg4[%c0_12, %c0_13] : memref<1x32xf32, #tpu.memory_space<vmem>>, vector<1x32xf32>
      %14 = vector.broadcast %13 : vector<1x32xf32> to vector<16x32xf32>
      %15 = arith.addf %12, %14 : vector<16x32xf32>
      %c0_14 = arith.constant 0 : index
      %c0_15 = arith.constant 0 : index
      %16 = vector.load %arg5[%c0_14, %c0_15] : memref<16x32xf32, #tpu.memory_space<vmem>>, vector<16x32xf32>
      %17 = arith.addf %15, %16 : vector<16x32xf32>
      %cst_16 = arith.constant dense<0.000000e+00> : vector<16xf32>
      %18 = vector.multi_reduction <add>, %17, %cst_16 [1] : vector<16x32xf32> to vector<16xf32>
      %19 = vector.shape_cast %18 : vector<16xf32> to vector<16x1xf32>
      %cst_17 = arith.constant 3.200000e+01 : f32
      %20 = vector.broadcast %cst_17 : f32 to vector<16x1xf32>
      %21 = arith.divf %19, %20 : vector<16x1xf32>
      %22 = vector.broadcast %21 : vector<16x1xf32> to vector<16x32xf32>
      %23 = arith.subf %17, %22 : vector<16x32xf32>
      %24 = arith.mulf %23, %23 : vector<16x32xf32>
      %cst_18 = arith.constant dense<0.000000e+00> : vector<16xf32>
      %25 = vector.multi_reduction <add>, %24, %cst_18 [1] : vector<16x32xf32> to vector<16xf32>
      %26 = vector.shape_cast %25 : vector<16xf32> to vector<16x1xf32>
      %cst_19 = arith.constant 3.200000e+01 : f32
      %27 = vector.broadcast %cst_19 : f32 to vector<16x1xf32>
      %28 = arith.divf %26, %27 : vector<16x1xf32>
      %29 = vector.broadcast %21 : vector<16x1xf32> to vector<16x32xf32>
      %30 = arith.subf %17, %29 : vector<16x32xf32>
      %cst_20 = arith.constant 9.99999996E-13 : f32
      %31 = vector.broadcast %cst_20 : f32 to vector<16x1xf32>
      %32 = arith.addf %28, %31 : vector<16x1xf32>
      %33 = math.rsqrt %32 : vector<16x1xf32>
      %34 = vector.broadcast %33 : vector<16x1xf32> to vector<16x32xf32>
      %35 = arith.mulf %30, %34 : vector<16x32xf32>
      %c0_21 = arith.constant 0 : index
      %c0_22 = arith.constant 0 : index
      %36 = vector.load %arg6[%c0_21, %c0_22] : memref<1x32xf32, #tpu.memory_space<vmem>>, vector<1x32xf32>
      %37 = vector.broadcast %36 : vector<1x32xf32> to vector<16x32xf32>
      %38 = arith.mulf %35, %37 : vector<16x32xf32>
      %c0_23 = arith.constant 0 : index
      %c0_24 = arith.constant 0 : index
      %39 = vector.load %arg7[%c0_23, %c0_24] : memref<1x32xf32, #tpu.memory_space<vmem>>, vector<1x32xf32>
      %40 = vector.broadcast %39 : vector<1x32xf32> to vector<16x32xf32>
      %41 = arith.addf %38, %40 : vector<16x32xf32>
      %c0_25 = arith.constant 0 : index
      %c0_26 = arith.constant 0 : index
      %42 = vector.load %arg8[%c0_25, %c0_26] : memref<16x32xf32, #tpu.memory_space<vmem>>, vector<16x32xf32>
      tpu.vector_store %arg8[%c0_25, %c0_26], %41 {strides = array<i32>} : memref<16x32xf32, #tpu.memory_space<vmem>>, vector<16x32xf32>,
    } else {
    }
    return
  }
  func.func @transform_0(%arg0: i32, %arg1: i32) -> (i32, i32) {
    %c0_i32 = arith.constant 0 : i32
    return %arg0, %arg1 : i32, i32
  }
  func.func @transform_1(%arg0: i32, %arg1: i32) -> (i32, i32) {
    %c0_i32 = arith.constant 0 : i32
    %c0_i32_0 = arith.constant 0 : i32
    return %arg1, %c0_i32 : i32, i32
  }
  func.func @transform_2(%arg0: i32, %arg1: i32) -> (i32, i32) {
    %c0_i32 = arith.constant 0 : i32
    %c0_i32_0 = arith.constant 0 : i32
    %c0_i32_1 = arith.constant 0 : i32
    return %c0_i32, %c0_i32_0 : i32, i32
  }
  func.func @transform_3(%arg0: i32, %arg1: i32) -> (i32, i32) {
    %c0_i32 = arith.constant 0 : i32
    %c0_i32_0 = arith.constant 0 : i32
    return %arg0, %c0_i32 : i32, i32
  }
  func.func @transform_4(%arg0: i32, %arg1: i32) -> (i32, i32) {
    %c0_i32 = arith.constant 0 : i32
    %c0_i32_0 = arith.constant 0 : i32
    %c0_i32_1 = arith.constant 0 : i32
    return %c0_i32, %c0_i32_0 : i32, i32
  }
  func.func @transform_5(%arg0: i32, %arg1: i32) -> (i32, i32) {
    %c0_i32 = arith.constant 0 : i32
    %c0_i32_0 = arith.constant 0 : i32
    %c0_i32_1 = arith.constant 0 : i32
    return %c0_i32, %c0_i32_0 : i32, i32
  }
  func.func @transform_6(%arg0: i32, %arg1: i32) -> (i32, i32) {
    %c0_i32 = arith.constant 0 : i32
    %c0_i32_0 = arith.constant 0 : i32
    return %arg0, %c0_i32 : i32, i32
  }
}

module attributes {stable_mosaic.version = 11 : i64} {
  func.func @_pool_kernel(%arg0: i32, %arg1: memref<1x8x32xf32, #tpu.memory_space<vmem>>, %arg2: memref<1x1x8xf32, #tpu.memory_space<vmem>>, %arg3: memref<1x1x32xf32, #tpu.memory_space<vmem>>) attributes {dimension_semantics = [#tpu.dimension_semantics<parallel>], iteration_bounds = array<i64: 2>, scalar_prefetch = 0 : i64, scratch_operands = 0 : i64, tpu.core_type = #tpu.core_type<tc>, window_params = [{transform_indices = @transform_0, window_bounds = array<i64: 1, 8, 32>}, {transform_indices = @transform_1, window_bounds = array<i64: 1, 1, 8>}, {transform_indices = @transform_2, window_bounds = array<i64: 1, 1, 32>}]} {
    %c0 = arith.constant 0 : index
    %c0_0 = arith.constant 0 : index
    %c0_1 = arith.constant 0 : index
    %0 = vector.load %arg1[%c0, %c0_0, %c0_1] : memref<1x8x32xf32, #tpu.memory_space<vmem>>, vector<1x8x32xf32>
    %1 = vector.shape_cast %0 : vector<1x8x32xf32> to vector<8x32xf32>
    %c0_2 = arith.constant 0 : index
    %c0_3 = arith.constant 0 : index
    %c0_4 = arith.constant 0 : index
    %2 = vector.load %arg2[%c0_2, %c0_3, %c0_4] : memref<1x1x8xf32, #tpu.memory_space<vmem>>, vector<1x1x8xf32>
    %3 = vector.shape_cast %2 : vector<1x1x8xf32> to vector<1x8xf32>
    %cst = arith.constant dense<0.000000e+00> : vector<1x32xf32>
    %4 = tpu.matmul %3, %1, %cst {dimension_numbers = #tpu.dot_dimension_numbers<[1], [0], [0], [1], [0, 0, 1, 1], [], []>} : vector<1x8xf32>, vector<8x32xf32>, vector<1x32xf32> -> vector<1x32xf32>
    %cst_5 = arith.constant dense<0.000000e+00> : vector<1xf32>
    %5 = vector.multi_reduction <add>, %3, %cst_5 [1] : vector<1x8xf32> to vector<1xf32>
    %6 = vector.shape_cast %5 : vector<1xf32> to vector<1x1xf32>
    %cst_6 = arith.constant 9.99999971E-10 : f32
    %7 = vector.broadcast %cst_6 : f32 to vector<1x1xf32>
    %8 = arith.maximumf %6, %7 : vector<1x1xf32>
    %9 = vector.broadcast %8 : vector<1x1xf32> to vector<1x32xf32>
    %10 = arith.divf %4, %9 : vector<1x32xf32>
    %c0_7 = arith.constant 0 : index
    %c0_8 = arith.constant 0 : index
    %c0_9 = arith.constant 0 : index
    %11 = vector.load %arg3[%c0_7, %c0_8, %c0_9] : memref<1x1x32xf32, #tpu.memory_space<vmem>>, vector<1x1x32xf32>
    %12 = vector.shape_cast %11 : vector<1x1x32xf32> to vector<1x32xf32>
    %13 = vector.shape_cast %10 : vector<1x32xf32> to vector<1x1x32xf32>
    tpu.vector_store %arg3[%c0_7, %c0_8, %c0_9], %13 {strides = array<i32>} : memref<1x1x32xf32, #tpu.memory_space<vmem>>, vector<1x1x32xf32>,
    return
  }
  func.func @transform_0(%arg0: i32) -> (i32, i32, i32) {
    %c0_i32 = arith.constant 0 : i32
    %c0_i32_0 = arith.constant 0 : i32
    %c0_i32_1 = arith.constant 0 : i32
    return %arg0, %c0_i32, %c0_i32_0 : i32, i32, i32
  }
  func.func @transform_1(%arg0: i32) -> (i32, i32, i32) {
    %c0_i32 = arith.constant 0 : i32
    %c0_i32_0 = arith.constant 0 : i32
    %c0_i32_1 = arith.constant 0 : i32
    return %arg0, %c0_i32, %c0_i32_0 : i32, i32, i32
  }
  func.func @transform_2(%arg0: i32) -> (i32, i32, i32) {
    %c0_i32 = arith.constant 0 : i32
    %c0_i32_0 = arith.constant 0 : i32
    %c0_i32_1 = arith.constant 0 : i32
    return %arg0, %c0_i32, %c0_i32_0 : i32, i32, i32
  }
}

</mosaic_0001>

<bundles_post_ra>
// kernel: sbert_forward.12
= control target key start
LH: loop header
LB: loop body
LE: loop exit
PB: predicated region body
PF: predicated region fallthrough
CT: control target
= control target key end

     0   :  { %vm16_vm0 = vcmask 261120   ;;  %s118_s0 = inlined_call_operand.vmem [shape: f32[16,32], index: 0, kind: input, shape index: {}]   ;;  %s119_s1 = inlined_call_operand.vmem [shape: f32[1,32], index: 1, kind: input, shape index: {}]   ;;  %s120_s2 = inlined_call_operand.vmem [shape: f32[1,32], index: 2, kind: input, shape index: {}]   ;;  %s121_s3 = inlined_call_operand.vmem [shape: f32[16,32], index: 3, kind: output, shape index: {}]  }
   0x1   :  { %v14_v0 = vld [vmem:[%s118_s0] sm:$0xff]  ;;  %v15_v1 = vld [vmem:[%s118_s0 + $0x8] sm:$0xff] }
   0x2   :  { %v17_v2 = vsel %vm16_vm0, %v14_v0, 0.0  ;;  %v20_v3 = vsel %vm16_vm0, %v15_v1, 0.0  ;;  %v68_v21 = vld [vmem:[%s119_s1] ss:$0 sm:$0xff] }
   0x3   :  { %18 = vadd.xlane.f32.xlu0 %v17_v2  ;;  %v69_v23 = vld [vmem:[%s120_s2] ss:$0 sm:$0xff] }
   0x7   :  { %21 = vadd.xlane.f32.xlu0 %v20_v3 }
  0x90   :  { %v19_v4 = vpop.xlane.xlu0 %18 }
  0x91   :  { %v24_v5 = vmul.f32 0.03125, %v19_v4 }
  0x93   :  { %v26_v6 = vsub.f32 %v14_v0, %v24_v5 }
  0x94   :  { %v22_v7 = vpop.xlane.xlu0 %21 }
  0x95   :  { %v25_v8 = vmul.f32 0.03125, %v22_v7  ;;  %v28_v9 = vmul.f32 %v26_v6, %v26_v6 }
  0x97   :  { %v27_v10 = vsub.f32 %v15_v1, %v25_v8  ;;  %v30_v11 = vsel %vm16_vm0, %v28_v9, 0.0 }
  0x98   :  { %31 = vadd.xlane.f32.xlu1 %v30_v11 }
  0x99   :  { %v29_v12 = vmul.f32 %v27_v10, %v27_v10 }
  0x9b   :  { %v33_v13 = vsel %vm16_vm0, %v29_v12, 0.0 }
  0x9c   :  { %34 = vadd.xlane.f32.xlu1 %v33_v13 }
 0x125   :  { %v32_v14 = vpop.xlane.xlu1 %31 }
 0x126   :  { %v36_v15 = vmul.f32 0.03125, %v32_v14 }
 0x128   :  { %v38_v16 = vadd.f32 1e-12, %v36_v15 }
 0x129   :  { %v35_v17 = vpop.xlane.xlu1 %34 }
 0x12a   :  { %70 = vrsqrt.f32 %v38_v16  ;;  %v37_v18 = vmul.f32 0.03125, %v35_v17 }
 0x12c   :  { %v39_v19 = vadd.f32 1e-12, %v37_v18 }
 0x12e   :  { %72 = vrsqrt.f32 %v39_v19 }
 0x134   :  { %v71_v20 = vpop.eup %70 }
 0x135   :  { %v42_v22 = vmul.f32 %v71_v20, %v26_v6 }
 0x137   :  { %v51_v24 = vmul.f32 %v68_v21, %v42_v22 }
 0x138   :  { %v73_v25 = vpop.eup %72 }
 0x139   :  { %v60_v26 = vadd.f32 %v69_v23, %v51_v24  ;;  %v43_v27 = vmul.f32 %v73_v25, %v27_v10 }
 0x13b   :  { %62 = vst.msk [vmem:[%s121_s3] sm:$0xff] %vm16_vm0, %v60_v26  ;;  %v52_v28 = vmul.f32 %v68_v21, %v43_v27 }
 0x13d   :  { %v61_v29 = vadd.f32 %v69_v23, %v52_v28 }
 0x13f   :  { %63 = vst.msk [vmem:[%s121_s3 + $0x8] sm:$0xff] %vm16_vm0, %v61_v29 }

// kernel: sbert_forward.13
= control target key start
LH: loop header
LB: loop body
LE: loop exit
PB: predicated region body
PF: predicated region fallthrough
CT: control target
= control target key end

     0   :  { %vm19_vm0 = vcmask 785408   ;;  %v145_v0 = vmov 0.0   ;;  %vm146_vm1 = vmmov 0   ;;  %vm43_vm2 = vcmask 261120   ;;  %s192_s1 = inlined_call_operand.vmem [shape: bf16[32,96], index: 1, kind: input, shape index: {}]   ;;  %s193_s0 = inlined_call_operand.vmem [shape: f32[16,32], index: 0, kind: input, shape index: {}]   ;;  %s194_s2 = inlined_call_operand.vmem [shape: f32[1,96], index: 2, kind: input, shape index: {}]   ;;  %s195_s3 = inlined_call_operand.vmem [shape: bf16[16,96], index: 3, kind: output, shape index: {}]  }
   0x1   :  { %133 = vmatprep.subr.bf16.mxu0 %v145_v0  ;;  %v143_v1 = vld [vmem:[%s192_s1] sm:$0xff]   ;;  %137 = vmatprep.mubr.msk.bf16.mxu0 %vm146_vm1, %v145_v0  ;;  %20 = vst.msk [vmem:[#allocation2] sm:$0xff] %vm19_vm0, %v145_v0  ;;  %21 = vst.msk [vmem:[#allocation2 + $0x8] sm:$0xff] %vm19_vm0, %v145_v0  ;;  %v144_v2 = vld [vmem:[%s192_s1 + $0x8] sm:$0xff]   ;;  %vm115_vm3 = vcmask 781312  }
   0x2   :  { %134 = vmatpush3.bf16.msra.mxu0 %v143_v1  ;;  %v22_v3 = vld [vmem:[%s193_s0] sm:$0xff]  ;;  %v23_v4 = vld [vmem:[%s193_s0 + $0x8] sm:$0xff] }
   0x3   :  { %135 = vmatprep.subr.bf16.mxu0 %v145_v0  ;;  %v24_v5 = vpack.c.bf16 %v23_v4, %v22_v3  ;;  %v125_v14 = vld [vmem:[%s194_s2] ss:$0 sm:$0xff] }
   0x6   :  { %136 = vmatpush3.bf16.msra.mxu0 %v144_v2 }
   0x8   :  { %v25_v6 = vld [vmem:[#allocation2] sm:$0xff]  ;;  %v26_v8 = vld [vmem:[#allocation2 + $0x8] sm:$0xff] }
   0x9   :  { %138 = vmatmul.mubr.msk.bf16.vlgmr.msra.gmra.mrb[0].mxu0 %vm43_vm2, %v24_v5 }
  0xdc   :  { %v81_v7 = vpop.f32.mrb[0].mxu0 }
  0xdd   :  { %v88_v9 = vadd.f32 %v81_v7, %v25_v6  ;;  %v139_v10 = vpop.f32.mrb[1].mxu0 }
  0xde   :  { %v84_v11 = vpop.f32.mrb[2].mxu0 }
  0xdf   :  { %91 = vst.msk [vmem:[#allocation2] sm:$0xff] %vm19_vm0, %v88_v9  ;;  %v89_v12 = vadd.f32 %v84_v11, %v26_v8  ;;  %v140_v13 = vpop.f32.mrb[3].mxu0 }
  0xe1   :  { %92 = vst.msk [vmem:[#allocation2 + $0x8] sm:$0xff] %vm19_vm0, %v89_v12 }
  0xe6   :  { %v96_v15 = vld [vmem:[#allocation2] sm:$0xff] }
  0xe7   :  { %v105_v16 = vadd.f32 %v125_v14, %v96_v15 }
  0xe8   :  { %v97_v17 = vld [vmem:[#allocation2 + $0x8] sm:$0xff] }
  0xe9   :  { %v128_v18 = vpack.c.bf16 %v105_v16, %v105_v16  ;;  %v106_v19 = vadd.f32 %v125_v14, %v97_v17 }
  0xeb   :  { %116 = vst.msk [vmem:[%s195_s3] sm:$0xf] %vm115_vm3, %v128_v18  ;;  %v129_v20 = vpack.c.bf16 %v106_v19, %v106_v19 }
  0xed   :  { %117 = vst.msk [vmem:[%s195_s3 + $0x4] sm:$0xf] %vm115_vm3, %v129_v20 }

// kernel: sbert_forward.15
= control target key start
LH: loop header
LB: loop body
LE: loop exit
PB: predicated region body
PF: predicated region fallthrough
CT: control target
= control target key end

     0   :  { %vm28_vm0 = vcmask 261120   ;;  %v201_v0 = vmov 0.0   ;;  %vm202_vm1 = vmmov 0   ;;  %s279_s1 = inlined_call_operand.vmem [shape: bf16[32,32], index: 1, kind: input, shape index: {}]   ;;  %s280_s0 = inlined_call_operand.vmem [shape: bf16[16,32], index: 0, kind: input, shape index: {}]   ;;  %s281_s2 = inlined_call_operand.vmem [shape: f32[1,32], index: 2, kind: input, shape index: {}]   ;;  %s282_s3 = inlined_call_operand.vmem [shape: f32[16,32], index: 3, kind: input, shape index: {}]   ;;  %s283_s4 = inlined_call_operand.vmem [shape: f32[1,32], index: 4, kind: input, shape index: {}]   ;;  %s284_s5 = inlined_call_operand.vmem [shape: f32[1,32], index: 5, kind: input, shape index: {}]   ;;  %s285_s6 = inlined_call_operand.vmem [shape: f32[16,32], index: 6, kind: output, shape index: {}]  }
   0x1   :  { %184 = vmatprep.subr.bf16.mxu0 %v201_v0  ;;  %v194_v1 = vld [vmem:[%s279_s1] sm:$0xff]   ;;  %188 = vmatprep.mubr.msk.bf16.mxu0 %vm202_vm1, %v201_v0  ;;  %29 = vst.msk [vmem:[#allocation2] sm:$0xff] %vm28_vm0, %v201_v0  ;;  %30 = vst.msk [vmem:[#allocation2 + $0x8] sm:$0xff] %vm28_vm0, %v201_v0  ;;  %v195_v2 = vld [vmem:[%s279_s1 + $0x8] sm:$0xff]  }
   0x2   :  { %185 = vmatpush3.bf16.msra.mxu0 %v194_v1  ;;  %v196_v3 = vld [vmem:[%s280_s0] sm:$0xff]   ;;  %v120_v17 = vld [vmem:[%s282_s3 + $0x8] sm:$0xff] }
   0x3   :  { %186 = vmatprep.subr.bf16.mxu0 %v201_v0  ;;  %v178_v12 = vld [vmem:[%s281_s2] ss:$0 sm:$0xff] }
   0x4   :  { %v119_v14 = vld [vmem:[%s282_s3] sm:$0xff] }
   0x5   :  { %v179_v40 = vld [vmem:[%s283_s4] ss:$0 sm:$0xff] }
   0x6   :  { %187 = vmatpush3.bf16.msra.mxu0 %v195_v2  ;;  %v180_v42 = vld [vmem:[%s284_s5] ss:$0 sm:$0xff] }
   0x8   :  { %v33_v4 = vld [vmem:[#allocation2] sm:$0xff]  ;;  %v34_v6 = vld [vmem:[#allocation2 + $0x8] sm:$0xff] }
   0x9   :  { %189 = vmatmul.mubr.msk.bf16.vlgmr.msra.gmra.mrb[0].mxu0 %vm28_vm0, %v196_v3 }
  0xdc   :  { %v94_v5 = vpop.f32.mrb[0].mxu0 }
  0xdd   :  { %v101_v7 = vadd.f32 %v94_v5, %v33_v4  ;;  %v190_v8 = vpop.f32.mrb[1].mxu0 }
  0xde   :  { %v97_v9 = vpop.f32.mrb[2].mxu0 }
  0xdf   :  { %103 = vst.msk [vmem:[#allocation2] sm:$0xff] %vm28_vm0, %v101_v7  ;;  %v102_v10 = vadd.f32 %v97_v9, %v34_v6  ;;  %v191_v11 = vpop.f32.mrb[3].mxu0 }
  0xe1   :  { %104 = vst.msk [vmem:[#allocation2 + $0x8] sm:$0xff] %vm28_vm0, %v102_v10 }
  0xe6   :  { %v108_v13 = vld [vmem:[#allocation2] sm:$0xff] }
  0xe7   :  { %v117_v15 = vadd.f32 %v178_v12, %v108_v13 }
  0xe8   :  { %v109_v16 = vld [vmem:[#allocation2 + $0x8] sm:$0xff] }
  0xe9   :  { %v121_v18 = vadd.f32 %v119_v14, %v117_v15  ;;  %v118_v19 = vadd.f32 %v178_v12, %v109_v16 }
  0xeb   :  { %v123_v20 = vsel %vm28_vm0, %v121_v18, 0.0  ;;  %v122_v21 = vadd.f32 %v120_v17, %v118_v19 }
  0xec   :  { %124 = vadd.xlane.f32.xlu0 %v123_v20 }
  0xed   :  { %v126_v22 = vsel %vm28_vm0, %v122_v21, 0.0 }
  0xf0   :  { %127 = vadd.xlane.f32.xlu0 %v126_v22 }
 0x179   :  { %v125_v23 = vpop.xlane.xlu0 %124 }
 0x17a   :  { %v130_v24 = vmul.f32 0.03125, %v125_v23 }
 0x17c   :  { %v132_v25 = vsub.f32 %v121_v18, %v130_v24 }
 0x17d   :  { %v128_v26 = vpop.xlane.xlu0 %127 }
 0x17e   :  { %v131_v27 = vmul.f32 0.03125, %v128_v26  ;;  %v134_v28 = vmul.f32 %v132_v25, %v132_v25 }
 0x180   :  { %v133_v29 = vsub.f32 %v122_v21, %v131_v27  ;;  %v136_v30 = vsel %vm28_vm0, %v134_v28, 0.0 }
 0x181   :  { %137 = vadd.xlane.f32.xlu1 %v136_v30 }
 0x182   :  { %v135_v31 = vmul.f32 %v133_v29, %v133_v29 }
 0x184   :  { %v139_v32 = vsel %vm28_vm0, %v135_v31, 0.0 }
 0x185   :  { %140 = vadd.xlane.f32.xlu1 %v139_v32 }
 0x20e   :  { %v138_v33 = vpop.xlane.xlu1 %137 }
 0x20f   :  { %v142_v34 = vmul.f32 0.03125, %v138_v33 }
 0x211   :  { %v144_v35 = vadd.f32 1e-12, %v142_v34 }
 0x212   :  { %v141_v36 = vpop.xlane.xlu1 %140 }
 0x213   :  { %197 = vrsqrt.f32 %v144_v35  ;;  %v143_v37 = vmul.f32 0.03125, %v141_v36 }
 0x215   :  { %v145_v38 = vadd.f32 1e-12, %v143_v37 }
 0x217   :  { %199 = vrsqrt.f32 %v145_v38 }
 0x21d   :  { %v198_v39 = vpop.eup %197 }
 0x21e   :  { %v148_v41 = vmul.f32 %v198_v39, %v132_v25 }
 0x220   :  { %v157_v43 = vmul.f32 %v179_v40, %v148_v41 }
 0x221   :  { %v200_v44 = vpop.eup %199 }
 0x222   :  { %v166_v45 = vadd.f32 %v180_v42, %v157_v43  ;;  %v149_v46 = vmul.f32 %v200_v44, %v133_v29 }
 0x224   :  { %168 = vst.msk [vmem:[%s285_s6] sm:$0xff] %vm28_vm0, %v166_v45  ;;  %v158_v47 = vmul.f32 %v179_v40, %v149_v46 }
 0x226   :  { %v167_v48 = vadd.f32 %v180_v42, %v158_v47 }
 0x228   :  { %169 = vst.msk [vmem:[%s285_s6 + $0x8] sm:$0xff] %vm28_vm0, %v167_v48 }

// kernel: sbert_forward.14
= control target key start
LH: loop header
LB: loop body
LE: loop exit
PB: predicated region body
PF: predicated region fallthrough
CT: control target
= control target key end

     0   :  { %s934_s9 = smov 0   ;;  %s936_s10 = smov 0   ;;  %s1049_s0 = inlined_call_operand.vmem [shape: bf16[2,8,96], index: 0, kind: input, shape index: {}]   ;;  %s1050_s1 = inlined_call_operand.vmem [shape: f32[2,1,8], index: 1, kind: input, shape index: {}]   ;;  %s1051_s2 = inlined_call_operand.vmem [shape: bf16[2,8,32], index: 2, kind: output, shape index: {}]  }
   0x1   :  { %s938_s11 = smov 0  }
   0x2 LB: > { %s24_s12 = sadd.s32 1, %s897_s10  ;;  %p743_p0 = scmp.ge.s32.totalorder %s901_s11, 1  ;;  %s901_s11 = sphi %s938_s11, %s12_s11   ;;  %s897_s10 = sphi %s936_s10, %s1053_s10   ;;  %s893_s9 = sphi %s934_s9, %s1052_s9  }
   0x3   : > { %p26_p1 = scmp.ge.s32.totalorder %s24_s12, 2  ;;  %p138_p2 = scmp.lt.s32.totalorder %s901_s11, 3 }
   0x5   : > { %s1055_s12 = smov (%p26_p1, %s24_s12), 0  ;;  %p139_p3 = pnand %p743_p0, %p138_p2 }
   0x6   : > { %p167_p4 = scmp.lt.s32.totalorder (!%p139_p3), %s893_s9, 1  ;;  %v903_v0 = vmov (!%p139_p3), 0.0   ;;  %vm904_vm0 = vmmov (!%p139_p3), 0   ;;  %s905_s17 = smov (!%p139_p3), 120   ;;  %vm198_vm1 = vcmask (!%p139_p3), 64512   ;;  %vm262_vm2 = vcmask (!%p139_p3), 1043456  }
   0x7   : > { %142 = sbr.rel (%p139_p3) target bundleno = 1603 (0x643), region = 28  ;;  %774 = vmatprep.subr.bf16.mxu0 (!%p139_p3), %v903_v0  ;;  %776 = vmatprep.mubr.msk.bf16.mxu0 (!%p139_p3), %vm904_vm0, %v903_v0  ;;  %s906_s18 = smov (!%p139_p3), 112   ;;  %vm649_vm3 = vcmask (!%p139_p3), 130048   ;;  %vm651_vm4 = vcmask (!%p139_p3), 195584   ;;  %vm654_vm5 = vcmask (!%p139_p3), 257024  }
   0x8   : > { %780 = vmatprep.subr.bf16.mxu1 (!%p139_p3), %v903_v0  ;;  %782 = vmatprep.mubr.msk.bf16.mxu1 (!%p139_p3), %vm904_vm0, %v903_v0  ;;  %s907_s19 = smov (!%p139_p3), 96   ;;  %s908_s23 = smov (!%p139_p3), 48  }
   0x9   : > { %s909_s24 = smov (!%p139_p3), 104   ;;  %s910_s25 = smov (!%p139_p3), 72  }
   0xa   : > { %s911_s26 = smov (!%p139_p3), 80   ;;  %s912_s27 = smov (!%p139_p3), 56  }
   0xb   : > { %s913_s28 = smov (!%p139_p3), 88   ;;  %s914_s29 = smov (!%p139_p3), 64  }
   0xc   : > { %s915_s30 = smov (!%p139_p3), 40   ;;  %s916_s3 = smov (!%p139_p3), 8  }
   0xd   : > { %s917_s4 = smov (!%p139_p3), 16   ;;  %s918_s5 = smov (!%p139_p3), 24  }
   0xe   : > { %s1057_s9 = smov (!%p167_p4, %s893_s9), 1 }
   0xf   : > { %s744_s13 = sshll.u32 %s1057_s9, 2  ;;  %s176_s22 = scalar_lea.vmem %s1050_s1, %s1057_s9 }
  0x10   : > { %s173_s16 = scalar_lea.vmem %s1049_s0, %s744_s13  ;;  %v980_v5 = vld [vmem:[%s176_s22] ss:$0 sm:$0xff]  ;;  %s183_s8 = scalar_lea.vmem %s1051_s2, %s744_s13 }
  0x11   : > { %v186_v1 = vld [vmem:[%s173_s16] sm:$0xf] }
  0x12   : > { %v966_v2 = vcombine.low %v186_v1, %v186_v1 }
  0x14   : > { %196 = vrot.lane.b32.xlu0 %v966_v2, %s905_s17  ;;  %257 = vrot.lane.b32.xlu1 %v966_v2, %s906_s18 }
  0x18   : > { %308 = vrot.lane.b32.xlu1 %v966_v2, %s907_s19 }
  0x86   : > { %v197_v3 = vpop.permute.xlu0 %196  ;;  %v258_v12 = vpop.permute.xlu1 %257 }
  0x87   : > { %v203_v4 = vsel %vm198_vm1, %v197_v3, 0  ;;  %v264_v13 = vsel %vm262_vm2, %v258_v12, 0 }
  0x88   : > { %775 = vmatpush3.bf16.xpose.msra.mxu0 %v203_v4  ;;  %781 = vmatpush3.bf16.msra.mxu1 %v264_v13 }
  0x89   : > { %792 = vmatprep.subr.bf16.mxu0 %v903_v0  ;;  %786 = vmatprep.subr.bf16.mxu1 %v903_v0 }
  0x8a   : > { %v309_v19 = vpop.permute.xlu1 %308 }
  0x8b   : > { %v314_v25 = vsel %vm198_vm1, %v309_v19, 0 }
  0x8f   : > { %777 = vmatmul.mubr.msk.bf16.vlgmr.msra.gmra.mrb[0].mxu0 %vm198_vm1, %v186_v1 }
  0x90   : > { %794 = vmatprep.mubr.msk.bf16.mxu0 %vm904_vm0, %v903_v0 }
 0x162   : > { %v239_v6 = vpop.f32.mrb[0].mxu0 }
 0x163   : > { %v240_v7 = vadd.f32 %v980_v5, %v239_v6  ;;  %v778_v8 = vpop.f32.mrb[1].mxu0 }
 0x164   : > { %v242_v9 = vpop.f32.mrb[2].mxu0 }
 0x165   : > { %v779_v10 = vpop.f32.mrb[3].mxu0  ;;  %v245_v11 = vsel %vm198_vm1, %v240_v7, -inf }
 0x166   : > { %246 = vmax.xlane.f32.xlu0 %v245_v11 }
 0x17c   : > { %528 = vrot.lane.b32.xlu0 %v966_v2, %s908_s23 }
 0x1f3   : > { %v247_v14 = vpop.xlane.xlu0 %246 }
 0x1f4   : > { %v248_v15 = vsub.f32 %v240_v7, %v247_v14 }
 0x1f6   : > { %v249_v16 = vmul.f32 1.442695, %v248_v15 }
 0x1f7   : > { %v529_v28 = vpop.permute.xlu0 %528 }
 0x1f8   : > { %863 = vpow2.f32 %v249_v16  ;;  %v534_v30 = vsel %vm198_vm1, %v529_v28, 0 }
 0x202   : > { %v864_v17 = vpop.eup %863 }
 0x203   : > { %v251_v18 = vsel %vm198_vm1, %v864_v17, 0.0 }
 0x204   : > { %252 = vadd.xlane.f32.xlu1 %v251_v18 }
 0x215   : > { %306 = vrot.lane.b32.xlu1 %v966_v2, %s909_s24 }
 0x219   : > { %418 = vrot.lane.b32.xlu1 %v966_v2, %s910_s25 }
 0x21d   : > { %416 = vrot.lane.b32.xlu1 %v966_v2, %s911_s26 }
 0x221   : > { %526 = vrot.lane.b32.xlu1 %v966_v2, %s912_s27 }
 0x291   : > { %v253_v20 = vpop.xlane.xlu1 %252 }
 0x292   : > { %865 = vrcp.f32 %v253_v20 }
 0x295   : > { %v307_v23 = vpop.permute.xlu1 %306 }
 0x299   : > { %v419_v26 = vpop.permute.xlu1 %418 }
 0x29a   : > { %v424_v27 = vsel %vm198_vm1, %v419_v26, 0 }
 0x29c   : > { %v866_v21 = vpop.eup %865 }
 0x29d   : > { %v255_v22 = vmul.f32 %v866_v21, %v864_v17  ;;  %v417_v29 = vpop.permute.xlu1 %416 }
 0x29f   : > { %v256_v24 = vpack.c.bf16 %v255_v22, %v255_v22 }
 0x2a1   : > { %783 = vmatmul.mubr.msk.bf16.vlgmr.msra.gmra.mrb[0].mxu1 %vm198_vm1, %v256_v24  ;;  %v527_v31 = vpop.permute.xlu1 %526 }
 0x2a2   : > { %787 = vmatpush3.bf16.xpose.msra.mxu1 %v314_v25  ;;  %788 = vmatprep.mubr.msk.bf16.mxu1 %vm904_vm0, %v903_v0 }
 0x2a3   : > { %798 = vmatprep.subr.bf16.mxu1 %v903_v0 }
 0x2a9   : > { %789 = vmatmul.mubr.msk.bf16.vlgmr.msra.gmra.mrb[4].mxu1 %vm198_vm1, %v307_v23 }
 0x2aa   : > { %799 = vmatpush3.bf16.xpose.msra.mxu1 %v424_v27  ;;  %800 = vmatprep.mubr.msk.bf16.mxu1 %vm904_vm0, %v903_v0 }
 0x2ab   : > { %810 = vmatprep.subr.bf16.mxu1 %v903_v0 }
 0x2b1   : > { %801 = vmatmul.mubr.msk.bf16.vlgmr.msra.gmra.mrb[8].mxu1 %vm198_vm1, %v417_v29 }
 0x2b2   : > { %811 = vmatpush3.bf16.xpose.msra.mxu1 %v534_v30  ;;  %812 = vmatprep.mubr.msk.bf16.mxu1 %vm904_vm0, %v903_v0 }
 0x2b9   : > { %813 = vmatmul.mubr.msk.bf16.vlgmr.msra.gmra.mrb[12].mxu1 %vm198_vm1, %v527_v31 }
 0x374   : > { %v1007_v32 = vpop.f32.mrb[0].mxu1 }
 0x375   : > { %v784_v33 = vpop.f32.mrb[1].mxu1 }
 0x376   : > { %v303_v34 = vpop.f32.mrb[2].mxu1 }
 0x377   : > { %v785_v35 = vpop.f32.mrb[3].mxu1 }
 0x37c   : > { %v350_v36 = vpop.f32.mrb[4].mxu1 }
 0x37d   : > { %v351_v37 = vadd.f32 %v980_v5, %v350_v36  ;;  %v790_v38 = vpop.f32.mrb[5].mxu1 }
 0x37e   : > { %v353_v39 = vpop.f32.mrb[6].mxu1 }
 0x37f   : > { %v791_v40 = vpop.f32.mrb[7].mxu1  ;;  %v356_v41 = vsel %vm198_vm1, %v351_v37, -inf }
 0x380   : > { %357 = vmax.xlane.f32.xlu1 %v356_v41 }
 0x384   : > { %v460_v42 = vpop.f32.mrb[8].mxu1 }
 0x385   : > { %v461_v43 = vadd.f32 %v980_v5, %v460_v42  ;;  %v802_v44 = vpop.f32.mrb[9].mxu1 }
 0x386   : > { %v463_v45 = vpop.f32.mrb[10].mxu1 }
 0x387   : > { %v466_v46 = vsel %vm198_vm1, %v461_v43, -inf  ;;  %v803_v47 = vpop.f32.mrb[11].mxu1 }
 0x388   : > { %467 = vmax.xlane.f32.xlu0 %v466_v46 }
 0x38c   : > { %v570_v48 = vpop.f32.mrb[12].mxu1 }
 0x38d   : > { %v571_v49 = vadd.f32 %v980_v5, %v570_v48  ;;  %v814_v50 = vpop.f32.mrb[13].mxu1 }
 0x38e   : > { %v573_v51 = vpop.f32.mrb[14].mxu1 }
 0x38f   : > { %v576_v52 = vsel %vm198_vm1, %v571_v49, -inf  ;;  %v815_v53 = vpop.f32.mrb[15].mxu1 }
 0x390   : > { %577 = vmax.xlane.f32.xlu1 %v576_v52 }
 0x40d   : > { %v358_v54 = vpop.xlane.xlu1 %357 }
 0x40e   : > { %v359_v55 = vsub.f32 %v351_v37, %v358_v54 }
 0x410   : > { %v360_v56 = vmul.f32 1.442695, %v359_v55 }
 0x412   : > { %867 = vpow2.f32 %v360_v56 }
 0x415   : > { %v468_v1 = vpop.xlane.xlu0 %467 }
 0x416   : > { %v469_v3 = vsub.f32 %v461_v43, %v468_v1 }
 0x418   : > { %v470_v4 = vmul.f32 1.442695, %v469_v3 }
 0x41c   : > { %v868_v57 = vpop.eup %867 }
 0x41d   : > { %v578_v58 = vpop.xlane.xlu1 %577  ;;  %v362_v59 = vsel %vm198_vm1, %v868_v57, 0.0 }
 0x41e   : > { %v579_v60 = vsub.f32 %v571_v49, %v578_v58  ;;  %363 = vadd.xlane.f32.xlu1 %v362_v59 }
 0x420   : > { %v580_v61 = vmul.f32 1.442695, %v579_v60 }
 0x422   : > { %869 = vpow2.f32 %v580_v61 }
 0x423   : > { %871 = vpow2.f32 %v470_v4 }
 0x42c   : > { %v870_v62 = vpop.eup %869 }
 0x42d   : > { %v582_v63 = vsel %vm198_vm1, %v870_v62, 0.0  ;;  %v872_v5 = vpop.eup %871 }
 0x42e   : > { %583 = vadd.xlane.f32.xlu0 %v582_v63  ;;  %v472_v6 = vsel %vm198_vm1, %v872_v5, 0.0 }
 0x42f   : > { %368 = vrot.lane.b32.xlu1 %v966_v2, %s913_s28 }
 0x444   : > { %478 = vrot.lane.b32.xlu0 %v966_v2, %s914_s29 }
 0x453   : > { %473 = vadd.xlane.f32.xlu1 %v472_v6 }
 0x464   : > { %588 = vrot.lane.b32.xlu1 %v966_v2, %s915_s30 }
 0x4ab   : > { %v364_v7 = vpop.xlane.xlu1 %363 }
 0x4ac   : > { %873 = vrcp.f32 %v364_v7 }
 0x4af   : > { %v369_v8 = vpop.permute.xlu1 %368 }
 0x4b0   : > { %v374_v9 = vsel %vm262_vm2, %v369_v8, 0 }
 0x4b1   : > { %793 = vmatpush3.bf16.msra.mxu0 %v374_v9 }
 0x4b2   : > { %804 = vmatprep.subr.bf16.mxu0 %v903_v0 }
 0x4b6   : > { %v874_v10 = vpop.eup %873 }
 0x4b7   : > { %v366_v11 = vmul.f32 %v874_v10, %v868_v57 }
 0x4b9   : > { %v367_v12 = vpack.c.bf16 %v366_v11, %v366_v11 }
 0x4bb   : > { %795 = vmatmul.mubr.msk.bf16.vlgmr.msra.gmra.mrb[4].mxu0 %vm198_vm1, %v367_v12  ;;  %v584_v13 = vpop.xlane.xlu0 %583 }
 0x4bc   : > { %806 = vmatprep.mubr.msk.bf16.mxu0 %vm904_vm0, %v903_v0 }
 0x4bf   : > { %v479_v14 = vpop.permute.xlu0 %478 }
 0x4c0   : > { %v484_v2 = vsel %vm262_vm2, %v479_v14, 0 }
 0x4c1   : > { %805 = vmatpush3.bf16.msra.mxu0 %v484_v2 }
 0x4c2   : > { %816 = vmatprep.subr.bf16.mxu0 %v903_v0 }
 0x4e0   : > { %v474_v15 = vpop.xlane.xlu1 %473 }
 0x4e1   : > { %875 = vrcp.f32 %v474_v15 }
 0x4e2   : > { %877 = vrcp.f32 %v584_v13 }
 0x4e4   : > { %v589_v17 = vpop.permute.xlu1 %588 }
 0x4e5   : > { %v594_v19 = vsel %vm262_vm2, %v589_v17, 0 }
 0x4eb   : > { %v876_v16 = vpop.eup %875 }
 0x4ec   : > { %v476_v18 = vmul.f32 %v876_v16, %v872_v5  ;;  %v878_v21 = vpop.eup %877 }
 0x4ed   : > { %v586_v22 = vmul.f32 %v878_v21, %v870_v62 }
 0x4ee   : > { %v477_v20 = vpack.c.bf16 %v476_v18, %v476_v18 }
 0x4ef   : > { %v587_v23 = vpack.c.bf16 %v586_v22, %v586_v22 }
 0x4f0   : > { %807 = vmatmul.mubr.msk.bf16.vlgmr.msra.gmra.mrb[8].mxu0 %vm198_vm1, %v477_v20 }
 0x4f1   : > { %817 = vmatpush3.bf16.msra.mxu0 %v594_v19  ;;  %818 = vmatprep.mubr.msk.bf16.mxu0 %vm904_vm0, %v903_v0 }
 0x4f8   : > { %819 = vmatmul.mubr.msk.bf16.vlgmr.msra.gmra.mrb[12].mxu0 %vm198_vm1, %v587_v23 }
 0x58e   : > { %v410_v24 = vpop.f32.mrb[4].mxu0 }
 0x58f   : > { %637 = vrot.lane.b32.xlu1 %v410_v24, %s916_s3  ;;  %v796_v25 = vpop.f32.mrb[5].mxu0 }
 0x590   : > { %v413_v26 = vpop.f32.mrb[6].mxu0 }
 0x591   : > { %v797_v27 = vpop.f32.mrb[7].mxu0 }
 0x5c3   : > { %v520_v28 = vpop.f32.mrb[8].mxu0 }
 0x5c4   : > { %641 = vrot.lane.b32.xlu0 %v520_v28, %s917_s4  ;;  %v808_v29 = vpop.f32.mrb[9].mxu0 }
 0x5c5   : > { %v523_v30 = vpop.f32.mrb[10].mxu0 }
 0x5c6   : > { %v809_v31 = vpop.f32.mrb[11].mxu0 }
 0x5cb   : > { %v630_v33 = vpop.f32.mrb[12].mxu0 }
 0x5cc   : > { %645 = vrot.lane.b32.xlu1 %v630_v33, %s918_s5  ;;  %v820_v0 = vpop.f32.mrb[13].mxu0 }
 0x5cd   : > { %v633_v34 = vpop.f32.mrb[14].mxu0 }
 0x5ce   : > { %v821_v35 = vpop.f32.mrb[15].mxu0 }
 0x601   : > { %v638_v36 = vpop.permute.xlu1 %637 }
 0x602   : > { %v648_v38 = vsel %vm198_vm1, %v1007_v32, %v638_v36 }
 0x636   : > { %v642_v37 = vpop.permute.xlu0 %641 }
 0x637   : > { %v650_v39 = vsel %vm649_vm3, %v648_v38, %v642_v37 }
 0x63e   : > { %v646_v40 = vpop.permute.xlu1 %645 }
 0x63f   : > { %v652_v41 = vsel %vm651_vm4, %v650_v39, %v646_v40 }
 0x640   : > { %v653_v42 = vpack.c.bf16 %v652_v41, %v652_v41 }
 0x642   : > { %655 = vst.msk [vmem:[%s183_s8] sm:$0xf] %vm654_vm5, %v653_v42 }
 0x643 PF: > { %s12_s11 = sadd.s32 1, %s901_s11   ;;  %s1052_s9 = smov %s897_s10 }
 0x644   : > { %p9_p5 = scmp.ge.s32.totalorder %s12_s11, 4   ;;  %s1053_s10 = smov %s1055_s12 }
 0x646   :  { %11 = sbr.rel (!%p9_p5) target bundleno = 2 (0x2), region = 61 }

// kernel: sbert_forward.16
= control target key start
LH: loop header
LB: loop body
LE: loop exit
PB: predicated region body
PF: predicated region fallthrough
CT: control target
= control target key end

     0   :  { %vm19_vm0 = vcmask 523264   ;;  %v167_v0 = vmov 0.0   ;;  %vm168_vm1 = vmmov 0   ;;  %vm43_vm2 = vcmask 261120   ;;  %s214_s1 = inlined_call_operand.vmem [shape: bf16[32,64], index: 1, kind: input, shape index: {}]   ;;  %s215_s0 = inlined_call_operand.vmem [shape: f32[16,32], index: 0, kind: input, shape index: {}]   ;;  %s216_s2 = inlined_call_operand.vmem [shape: f32[1,64], index: 2, kind: input, shape index: {}]   ;;  %s217_s3 = inlined_call_operand.vmem [shape: bf16[16,64], index: 3, kind: output, shape index: {}]  }
   0x1   :  { %151 = vmatprep.subr.bf16.mxu0 %v167_v0  ;;  %v161_v1 = vld [vmem:[%s214_s1] sm:$0xff]   ;;  %155 = vmatprep.mubr.msk.bf16.mxu0 %vm168_vm1, %v167_v0  ;;  %20 = vst.msk [vmem:[#allocation2] sm:$0xff] %vm19_vm0, %v167_v0  ;;  %21 = vst.msk [vmem:[#allocation2 + $0x8] sm:$0xff] %vm19_vm0, %v167_v0  ;;  %v162_v2 = vld [vmem:[%s214_s1 + $0x8] sm:$0xff]   ;;  %vm133_vm3 = vcmask 519168  }
   0x2   :  { %152 = vmatpush3.bf16.msra.mxu0 %v161_v1  ;;  %v22_v3 = vld [vmem:[%s215_s0] sm:$0xff]  ;;  %v23_v4 = vld [vmem:[%s215_s0 + $0x8] sm:$0xff] }
   0x3   :  { %153 = vmatprep.subr.bf16.mxu0 %v167_v0  ;;  %v24_v5 = vpack.c.bf16 %v23_v4, %v22_v3  ;;  %v143_v14 = vld [vmem:[%s216_s2] ss:$0 sm:$0xff] }
   0x6   :  { %154 = vmatpush3.bf16.msra.mxu0 %v162_v2 }
   0x8   :  { %v25_v6 = vld [vmem:[#allocation2] sm:$0xff]  ;;  %v26_v8 = vld [vmem:[#allocation2 + $0x8] sm:$0xff] }
   0x9   :  { %156 = vmatmul.mubr.msk.bf16.vlgmr.msra.gmra.mrb[0].mxu0 %vm43_vm2, %v24_v5 }
  0xdc   :  { %v81_v7 = vpop.f32.mrb[0].mxu0 }
  0xdd   :  { %v88_v9 = vadd.f32 %v81_v7, %v25_v6  ;;  %v157_v10 = vpop.f32.mrb[1].mxu0 }
  0xde   :  { %v84_v11 = vpop.f32.mrb[2].mxu0 }
  0xdf   :  { %91 = vst.msk [vmem:[#allocation2] sm:$0xff] %vm19_vm0, %v88_v9  ;;  %v89_v12 = vadd.f32 %v84_v11, %v26_v8  ;;  %v158_v13 = vpop.f32.mrb[3].mxu0 }
  0xe1   :  { %92 = vst.msk [vmem:[#allocation2 + $0x8] sm:$0xff] %vm19_vm0, %v89_v12 }
  0xe6   :  { %v96_v15 = vld [vmem:[#allocation2] sm:$0xff] }
  0xe7   :  { %v105_v16 = vadd.f32 %v143_v14, %v96_v15 }
  0xe8   :  { %v97_v17 = vld [vmem:[#allocation2 + $0x8] sm:$0xff] }
  0xe9   :  { %v109_v18 = vmul.f32 0.044715, %v105_v16  ;;  %v106_v19 = vadd.f32 %v143_v14, %v97_v17  ;;  %v107_v30 = vmul.f32 0.5, %v105_v16 }
  0xeb   :  { %v111_v20 = vmul.f32 %v109_v18, %v105_v16  ;;  %v110_v21 = vmul.f32 0.044715, %v106_v19  ;;  %v108_v34 = vmul.f32 0.5, %v106_v19 }
  0xed   :  { %v113_v22 = vmul.f32 %v111_v20, %v105_v16  ;;  %v112_v23 = vmul.f32 %v110_v21, %v106_v19 }
  0xef   :  { %v115_v24 = vadd.f32 %v113_v22, %v105_v16  ;;  %v114_v25 = vmul.f32 %v112_v23, %v106_v19 }
  0xf1   :  { %v117_v26 = vmul.f32 0.7978846, %v115_v24  ;;  %v116_v27 = vadd.f32 %v114_v25, %v106_v19 }
  0xf3   :  { %163 = vtanh.f32 %v117_v26  ;;  %v118_v28 = vmul.f32 0.7978846, %v116_v27 }
  0xf5   :  { %165 = vtanh.f32 %v118_v28 }
  0xfd   :  { %v164_v29 = vpop.eup %163 }
  0xfe   :  { %v121_v31 = vadd.f32 1.0, %v164_v29 }
  0xff   :  { %v166_v32 = vpop.eup %165 }
 0x100   :  { %v123_v33 = vmul.f32 %v121_v31, %v107_v30  ;;  %v122_v35 = vadd.f32 1.0, %v166_v32 }
 0x102   :  { %v146_v36 = vpack.c.bf16 %v123_v33, %v123_v33  ;;  %v124_v37 = vmul.f32 %v122_v35, %v108_v34 }
 0x104   :  { %134 = vst.msk [vmem:[%s217_s3] sm:$0xf] %vm133_vm3, %v146_v36  ;;  %v147_v38 = vpack.c.bf16 %v124_v37, %v124_v37 }
 0x106   :  { %135 = vst.msk [vmem:[%s217_s3 + $0x4] sm:$0xf] %vm133_vm3, %v147_v38 }

// kernel: sbert_forward.23
= control target key start
LH: loop header
LB: loop body
LE: loop exit
PB: predicated region body
PF: predicated region fallthrough
CT: control target
= control target key end

     0   :  { %7 = vsyncpa [#allocation3], 0  ;;  %s558_s0 = inlined_call_operand.vmem [shape: f32[2,8,32], index: 0, kind: input, shape index: {}]   ;;  %s559_s1 = inlined_call_operand.vmem [shape: f32[2,1,8], index: 1, kind: input, shape index: {}]   ;;  %s560_s2 = inlined_call_operand.hbm [shape: f32[2,1,32], index: 2, kind: output, shape index: {}]  }
   0x1   :  { %9 = vsyncpa [#allocation3 + $0x1], 0  ;;  %s455_s9 = smov 0   ;;  %s457_s10 = smov 0  }
   0x2   :  { %s459_s11 = smov 0   ;;  %s461_s12 = smov 0  }
   0x3 LB: > { %s476_s13 = sadd.s32 4294967295, %s435_s12   ;;  %s314_s14 = sadd.s32 4294967294, %s435_s12   ;;  %s435_s12 = sphi %s461_s12, %s566_s12   ;;  %s431_s11 = sphi %s459_s11, %s565_s11   ;;  %s427_s10 = sphi %s457_s10, %s564_s10   ;;  %s423_s9 = sphi %s455_s9, %s563_s9  }
   0x4   : > { %s480_s15 = sadd.s32 1, %s435_s12   ;;  %s74_s16 = sadd.s32 1, %s431_s11 }
   0x5   : > { %s71_s17 = ssub.s32 %s435_s12, %s480_s15  ;;  %p84_p0 = scmp.ne.s32.totalorder %s431_s11, %s427_s10 }
   0x6   : > { %p72_p1 = scmp.eq.s32.totalorder %s71_s17, 0  ;;  %p85_p2 = scmp.eq.s32.totalorder %s476_s13, 1 }
   0x7   : > { %p90_p3 = scmp.ne.s32.totalorder %s427_s10, %s423_s9  ;;  %p91_p4 = scmp.eq.s32.totalorder %s314_s14, 1 }
   0x8   : > { %s491_s18 = scalar_select %p72_p1, %s431_s11, %s74_s16  }
   0x9   : > { %p493_p5 = por %p85_p2, %p84_p0  ;;  %p497_p6 = por %p91_p4, %p90_p3 }
   0xa   : > { %p317_p7 = scmp.ge.s32.totalorder %s435_s12, 1  ;;  %p122_p8 = scmp.lt.s32.totalorder %s435_s12, 3 }
   0xc   : > { %p123_p9 = pnand %p317_p7, %p122_p8 }
   0xd   : > { %p145_p10 = scmp.lt.s32.totalorder (!%p123_p9), %s476_s13, 1  ;;  %v437_v0 = vmov (!%p123_p9), 0.0   ;;  %vm438_vm0 = vmmov (!%p123_p9), 0   ;;  %vm228_vm1 = vcmask (!%p123_p9), 57344   ;;  %vm154_vm2 = vcmask (!%p123_p9), 64512   ;;  %s143_s29 = sand.u32 (!%p123_p9), 1, %s427_s10  }
   0xe   : > { %126 = sbr.rel (%p123_p9) target bundleno = 255 (0xff), region = 28  ;;  %325 = vmatprep.subr.mxu0 (!%p123_p9), %v437_v0  ;;  %327 = vmatprep.mubr.msk.f32.mxu0 (!%p123_p9), %vm438_vm0, %v437_v0  ;;  %s320_s30 = sshll.u32 (!%p123_p9), %s476_s13, 4  ;;  %vm235_vm3 = vcmask (!%p123_p9), 253952  }
   0xf   : > { %s144_s3 = scalar_lea.vmem (!%p123_p9), [#allocation2], %s143_s29  ;;  %s516_s7 = scalar_lea.hbm (!%p123_p9), %s560_s2, %s320_s30 }
  0x10   : > { %s250_s4 = sshll.u32 (!%p123_p9), %s144_s3, 4  ;;  %s238_s8 = scalar_lea.sflag (!%p123_p9), [#allocation3], %s143_s29  ;;  %s518_s4 = int_to_ptr.vmem [resolvable:$true] %s250_s4 }
  0x11   : > { %s373_s14 = scalar_lea.vmem (!%p123_p9), %s518_s4, 16 }
  0x12   : > { %p374_p11 = scmp.ne.s32.totalorder (!%p123_p9), %s518_s4, %s373_s14 }
  0x14   : > { %p375_p12 = pnand (!%p123_p9), %p374_p11, %p493_p5 }
  0x15   : > { %s146_s21 = scalar_select %p145_p10, %s476_s13, 1 }
  0x16   : > { %p376_p13 = pneg %p375_p12  ;;  %s439_s13 = smov [#allocation2]  }
  0x17   : > { %s318_s22 = sshll.u32 %s146_s21, 3  ;;  %s151_s25 = scalar_lea.vmem %s559_s1, %s146_s21 }
  0x18   : > { %s148_s28 = scalar_lea.vmem %s558_s0, %s318_s22  ;;  %v153_v1 = vld [vmem:[%s151_s25] sm:$0x1]  ;;  %s377_s16 = sshll.u32 %s439_s13, 4  ;;  %s378_s16 = int_to_ptr.vmem [resolvable:$false] %s377_s16 }
  0x19   : > { %v152_v2 = vld [vmem:[%s148_s28] sm:$0xff]  ;;  %v229_v3 = vsel %vm228_vm1, %v153_v1, 0.0  ;;  %s379_s17 = scalar_lea.vmem %s378_s16, 32  ;;  %p380_p0 = scmp.lt.s32.totalorder %s518_s4, %s378_s16 }
  0x1a   : > { %326 = vmatpush3.msra.mxu0 %v152_v2  ;;  %230 = vadd.xlane.f32.xlu0 %v229_v3  ;;  %p381_p1 = scmp.lt.s32.totalorder %s379_s17, %s373_s14 }
  0x1b   : > { %328 = vmatmul.mubr.msk.f32.vlgmr.msra.gmra.mrb[0].mxu0 %vm154_vm2, %v153_v1 }
  0x1c   : > { %p382_p2 = por %p381_p1, %p380_p0 }
  0x1e   : > { %p383_p3 = pnand %p382_p2, %p376_p13 }
  0xa7   : > { %v231_v4 = vpop.xlane.xlu0 %230 }
  0xa8   : > { %v232_v5 = vmax.f32 %v231_v4, 1e-09 }
  0xaa   : > { %371 = vrcp.f32 %v232_v5 }
  0xb4   : > { %v372_v6 = vpop.eup %371 }
  0xee   : > { %v224_v7 = vpop.f32.mrb[0].mxu0 }
  0xef   : > { %v234_v8 = vmul.f32 %v372_v6, %v224_v7  ;;  %v329_v9 = vpop.f32.mrb[1].mxu0 }
  0xf1   : > { %236 = vst.msk [vmem:[%s144_s3] sm:$0x1] %vm235_vm3, %v234_v8 }
  0xf2   : > { %386 = shalt.err (!%p383_p3)
}
  0xf3   : > { %s387_s21 = scalar_lea.hbm %s516_s7, 16  ;;  %s391_s24 = scalar_lea.hbm %s560_s2, 32 }
  0xf4   : > { %p388_p4 = scmp.ne.s32.totalorder %s516_s7, %s387_s21  ;;  %p392_p9 = scmp.lt.u32.totalorder %s516_s7, %s560_s2 }
  0xf5   : > { %p393_p10 = scmp.lt.u32.totalorder %s391_s24, %s387_s21  ;;  %p395_p12 = scmp.lt.u32.totalorder %s387_s21, %s516_s7 }
  0xf6   : > { %p389_p7 = pnand %p388_p4, %p493_p5 }
  0xf7   : > { %p394_p11 = por %p393_p10, %p392_p9 }
  0xf8   : > { %p390_p8 = pneg %p389_p7 }
  0xf9   : > { %p396_p13 = por %p395_p12, %p394_p11 }
  0xfb   : > { %p397_p0 = pnand %p396_p13, %p390_p8 }
  0xfd   : > { %400 = shalt.err (!%p397_p0)
}
  0xfe   : > { %330 = dma.vmem_to_hbm [thread:$0]  (%p493_p5), %s518_s4, 16, %s516_s7, %s238_s8  }
  0xff PF: > { %p336_p1 = scmp.ge.s32.totalorder %s435_s12, 2  ;;  %s262_s27 = sand.u32 1, %s423_s9  }
 0x100   : > { %s263_s28 = scalar_lea.sflag [#allocation3], %s262_s27 }
 0x101   : > { %p333_p2 = pnand %p336_p1, %p497_p6 }
 0x103   : > { %418 = dma.done.wait (!%p333_p2), %s263_s28, 16  }
 0x104   : > { %420 = vsyncadd (!%p333_p2), %s263_s28, 4294967280  ;;  %p12_p3 = scmp.ge.s32.totalorder %s480_s15, 4   ;;  %s563_s9 = smov %s427_s10 }
 0x105   : > { %s564_s10 = smov %s431_s11  ;;  %s565_s11 = smov %s491_s18 }
 0x106   : > { %s566_s12 = smov %s480_s15  ;;  %14 = sbr.rel (!%p12_p3) target bundleno = 3 (0x3), region = 66 }
 0x10d   :  { %267 = vsyncpa [#allocation3], 1 }
 0x10e   :  { %269 = vsyncpa [#allocation3 + $0x1], 1 }

// kernel: sbert_forward.17
= control target key start
LH: loop header
LB: loop body
LE: loop exit
PB: predicated region body
PF: predicated region fallthrough
CT: control target
= control target key end

     0   :  { %vm28_vm0 = vcmask 261120   ;;  %v228_v0 = vmov 0.0   ;;  %vm229_vm1 = vmmov 0   ;;  %vm72_vm2 = vcmask 523264   ;;  %s311_s1 = inlined_call_operand.vmem [shape: bf16[64,32], index: 1, kind: input, shape index: {}]   ;;  %s312_s0 = inlined_call_operand.vmem [shape: bf16[16,64], index: 0, kind: input, shape index: {}]   ;;  %s313_s2 = inlined_call_operand.vmem [shape: f32[1,32], index: 2, kind: input, shape index: {}]   ;;  %s314_s3 = inlined_call_operand.vmem [shape: f32[16,32], index: 3, kind: input, shape index: {}]   ;;  %s315_s4 = inlined_call_operand.vmem [shape: f32[1,32], index: 4, kind: input, shape index: {}]   ;;  %s316_s5 = inlined_call_operand.vmem [shape: f32[1,32], index: 5, kind: input, shape index: {}]   ;;  %s317_s6 = inlined_call_operand.vmem [shape: f32[16,32], index: 6, kind: output, shape index: {}]  }
   0x1   :  { %205 = vmatprep.subr.bf16.mxu0 %v228_v0  ;;  %v219_v1 = vld [vmem:[%s311_s1] sm:$0xff]   ;;  %213 = vmatprep.mubr.msk.bf16.mxu0 %vm229_vm1, %v228_v0  ;;  %29 = vst.msk [vmem:[#allocation2] sm:$0xff] %vm28_vm0, %v228_v0  ;;  %30 = vst.msk [vmem:[#allocation2 + $0x8] sm:$0xff] %vm28_vm0, %v228_v0  ;;  %v220_v2 = vld [vmem:[%s311_s1 + $0x8] sm:$0xff]  }
   0x2   :  { %206 = vmatpush3.bf16.msra.mxu0 %v219_v1  ;;  %v221_v3 = vld [vmem:[%s311_s1 + $0x10] sm:$0xff]   ;;  %v222_v4 = vld [vmem:[%s311_s1 + $0x18] sm:$0xff]   ;;  %v223_v5 = vld [vmem:[%s312_s0] sm:$0xff]  }
   0x3   :  { %207 = vmatprep.subr.bf16.mxu0 %v228_v0  ;;  %v197_v14 = vld [vmem:[%s313_s2] ss:$0 sm:$0xff]  ;;  %v137_v19 = vld [vmem:[%s314_s3 + $0x8] sm:$0xff] }
   0x4   :  { %v136_v16 = vld [vmem:[%s314_s3] sm:$0xff] }
   0x5   :  { %v198_v42 = vld [vmem:[%s315_s4] ss:$0 sm:$0xff] }
   0x6   :  { %208 = vmatpush3.bf16.msra.mxu0 %v220_v2  ;;  %v199_v44 = vld [vmem:[%s316_s5] ss:$0 sm:$0xff] }
   0x7   :  { %209 = vmatprep.subr.bf16.mxu0 %v228_v0 }
   0x8   :  { %v33_v6 = vld [vmem:[#allocation2] sm:$0xff]  ;;  %v34_v8 = vld [vmem:[#allocation2 + $0x8] sm:$0xff] }
   0xa   :  { %210 = vmatpush3.bf16.msra.mxu0 %v221_v3 }
   0xb   :  { %211 = vmatprep.subr.bf16.mxu0 %v228_v0 }
   0xe   :  { %212 = vmatpush3.bf16.msra.mxu0 %v222_v4 }
  0x11   :  { %214 = vmatmul.mubr.msk.bf16.vlgmr.msra.gmra.mrb[0].mxu0 %vm72_vm2, %v223_v5 }
  0xe4   :  { %v110_v7 = vpop.f32.mrb[0].mxu0 }
  0xe5   :  { %v117_v9 = vadd.f32 %v110_v7, %v33_v6  ;;  %v215_v10 = vpop.f32.mrb[1].mxu0 }
  0xe6   :  { %v113_v11 = vpop.f32.mrb[2].mxu0 }
  0xe7   :  { %120 = vst.msk [vmem:[#allocation2] sm:$0xff] %vm28_vm0, %v117_v9  ;;  %v118_v12 = vadd.f32 %v113_v11, %v34_v8  ;;  %v216_v13 = vpop.f32.mrb[3].mxu0 }
  0xe9   :  { %121 = vst.msk [vmem:[#allocation2 + $0x8] sm:$0xff] %vm28_vm0, %v118_v12 }
  0xee   :  { %v125_v15 = vld [vmem:[#allocation2] sm:$0xff] }
  0xef   :  { %v134_v17 = vadd.f32 %v197_v14, %v125_v15 }
  0xf0   :  { %v126_v18 = vld [vmem:[#allocation2 + $0x8] sm:$0xff] }
  0xf1   :  { %v138_v20 = vadd.f32 %v136_v16, %v134_v17  ;;  %v135_v21 = vadd.f32 %v197_v14, %v126_v18 }
  0xf3   :  { %v140_v22 = vsel %vm28_vm0, %v138_v20, 0.0  ;;  %v139_v23 = vadd.f32 %v137_v19, %v135_v21 }
  0xf4   :  { %141 = vadd.xlane.f32.xlu0 %v140_v22 }
  0xf5   :  { %v143_v24 = vsel %vm28_vm0, %v139_v23, 0.0 }
  0xf8   :  { %144 = vadd.xlane.f32.xlu0 %v143_v24 }
 0x181   :  { %v142_v25 = vpop.xlane.xlu0 %141 }
 0x182   :  { %v147_v26 = vmul.f32 0.03125, %v142_v25 }
 0x184   :  { %v149_v27 = vsub.f32 %v138_v20, %v147_v26 }
 0x185   :  { %v145_v28 = vpop.xlane.xlu0 %144 }
 0x186   :  { %v148_v29 = vmul.f32 0.03125, %v145_v28  ;;  %v151_v30 = vmul.f32 %v149_v27, %v149_v27 }
 0x188   :  { %v150_v31 = vsub.f32 %v139_v23, %v148_v29  ;;  %v153_v32 = vsel %vm28_vm0, %v151_v30, 0.0 }
 0x189   :  { %154 = vadd.xlane.f32.xlu1 %v153_v32 }
 0x18a   :  { %v152_v33 = vmul.f32 %v150_v31, %v150_v31 }
 0x18c   :  { %v156_v34 = vsel %vm28_vm0, %v152_v33, 0.0 }
 0x18d   :  { %157 = vadd.xlane.f32.xlu1 %v156_v34 }
 0x216   :  { %v155_v35 = vpop.xlane.xlu1 %154 }
 0x217   :  { %v159_v36 = vmul.f32 0.03125, %v155_v35 }
 0x219   :  { %v161_v37 = vadd.f32 1e-12, %v159_v36 }
 0x21a   :  { %v158_v38 = vpop.xlane.xlu1 %157 }
 0x21b   :  { %224 = vrsqrt.f32 %v161_v37  ;;  %v160_v39 = vmul.f32 0.03125, %v158_v38 }
 0x21d   :  { %v162_v40 = vadd.f32 1e-12, %v160_v39 }
 0x21f   :  { %226 = vrsqrt.f32 %v162_v40 }
 0x225   :  { %v225_v41 = vpop.eup %224 }
 0x226   :  { %v165_v43 = vmul.f32 %v225_v41, %v149_v27 }
 0x228   :  { %v174_v45 = vmul.f32 %v198_v42, %v165_v43 }
 0x229   :  { %v227_v46 = vpop.eup %226 }
 0x22a   :  { %v183_v47 = vadd.f32 %v199_v44, %v174_v45  ;;  %v166_v48 = vmul.f32 %v227_v46, %v150_v31 }
 0x22c   :  { %185 = vst.msk [vmem:[%s317_s6] sm:$0xff] %vm28_vm0, %v183_v47  ;;  %v175_v49 = vmul.f32 %v198_v42, %v166_v48 }
 0x22e   :  { %v184_v50 = vadd.f32 %v199_v44, %v175_v49 }
 0x230   :  { %186 = vst.msk [vmem:[%s317_s6 + $0x8] sm:$0xff] %vm28_vm0, %v184_v50 }

</bundles_post_ra>
